<compile_context>
chip_gen: v7x
topology: tpu7x:2x2x1
jax: 0.10.0
libtpu: 0.0.40
codegen_flags: <defaults>
</compile_context>

<pallas_src>
import functools

import jax
import jax.numpy as jnp
import numpy as np
from jax.experimental import pallas as pl
from jax.experimental.pallas import tpu as pltpu


# ---------------------------------------------------------------------------
# Pallas kernels
# ---------------------------------------------------------------------------
def make_stage_a_kernel(H, K, eps):
    """Fused BatchNorm2d + grouped Conv2d, channels-last lane-dense layout.

    x_ref     : (N*H, W*C) f32   rows = (n, h), lanes = (w, c)
    gamma/beta/bias_ref : (1, W*C) f32   per-channel values tiled across w
    gmat_ref  : (W*C, W*C) f32   per-channel group-indicator / count (stats matmul)
    w_ref     : (K*W*C, W*C) bf16  stacked banded conv matrix (kh-major rows)
    o_ref     : (N*H, W*C) f32
    """
    P = K // 2

    def kernel(x_ref, gamma_ref, beta_ref, gmat_ref, w_ref, bias_ref, o_ref):
        x = x_ref[...]                                          # (NH, WC) f32
        NH = x.shape[0]

        # ---- single-pass BN statistics (biased variance), folded scale/shift ----
        s1 = jnp.sum(x, axis=0, keepdims=True)                  # (1, WC)
        s2 = jnp.sum(x * x, axis=0, keepdims=True)              # (1, WC)
        stats = jnp.concatenate([s1, s2], axis=0)               # (2, WC)
        gstats = jnp.dot(stats, gmat_ref[...],
                         preferred_element_type=jnp.float32)    # (2, WC) per-channel means
        mean = gstats[0:1, :]
        var = gstats[1:2, :] - mean * mean
        scale = gamma_ref[...] * jax.lax.rsqrt(var + eps)
        shift = beta_ref[...] - mean * scale
        xn = (x * scale + shift).astype(jnp.bfloat16)           # (NH, WC) bf16

        # ---- im2col over kh: K row-shifted copies concatenated along lanes ----
        # Row r = n*H + h; shifting h by dh must not leak across images -> mask rows whose
        # h+dh falls outside [0, H).  kw shifts / W-boundary zeros live inside w_ref.
        row_h = jax.lax.broadcasted_iota(jnp.int32, (NH, 1), 0) % H
        zero_rows = jnp.zeros((P, xn.shape[1]), xn.dtype)
        parts = []
        for kh in range(K):
            dh = kh - P
            if dh == 0:
                parts.append(xn)
                continue
            if dh < 0:
                sh = jnp.concatenate([zero_rows[:-dh], xn[:NH + dh, :]], axis=0)
                mask = (row_h + dh >= 0).astype(xn.dtype)
            else:
                sh = jnp.concatenate([xn[dh:, :], zero_rows[:dh]], axis=0)
                mask = (row_h + dh < H).astype(xn.dtype)
            parts.append(sh * mask)
        win = jnp.concatenate(parts, axis=1)                    # (NH, K*WC) bf16

        acc = jnp.dot(win, w_ref[...], preferred_element_type=jnp.float32)
        o_ref[...] = acc + bias_ref[...]                        # lane-dense (NH, WC) store

    return kernel


def make_stage_b_kernel(eps):
    """Fused BatchNorm1d + grouped Conv1d on the flat (M, C*T) layout.

    z_ref  : (M, C*T) f32   rows = m, lanes = (c, t) (the raw (M, C, T) buffer, row-major)
    w_ref  : (C*T, C*T) bf16  banded block-diagonal conv matrix (t padding baked in)
    """

    def kernel(z_ref, gamma_ref, beta_ref, gmat_ref, w_ref, bias_ref, o_ref):
        z = z_ref[...]
        s1 = jnp.sum(z, axis=0, keepdims=True)
        s2 = jnp.sum(z * z, axis=0, keepdims=True)
        stats = jnp.concatenate([s1, s2], axis=0)
        gstats = jnp.dot(stats, gmat_ref[...], preferred_element_type=jnp.float32)
        mean = gstats[0:1, :]
        var = gstats[1:2, :] - mean * mean
        scale = gamma_ref[...] * jax.lax.rsqrt(var + eps)
        shift = beta_ref[...] - mean * scale
        zn = (z * scale + shift).astype(jnp.bfloat16)
        acc = jnp.dot(zn, w_ref[...], preferred_element_type=jnp.float32)
        o_ref[...] = acc + bias_ref[...]

    return kernel


# ---------------------------------------------------------------------------
# pallas_call wrappers (grid-less: whole problem fits comfortably in VMEM)
# ---------------------------------------------------------------------------
def _full_spec(shape):
    rank = len(shape)
    return pl.BlockSpec(shape, lambda: (0,) * rank)


def stage_a_call(x_cl, gamma_t, beta_t, g_mat, w_mat, bias_t, *, H, K, eps):
    NH, WC = x_cl.shape
    return pl.pallas_call(
        make_stage_a_kernel(H, K, eps),
        out_shape=jax.ShapeDtypeStruct((NH, WC), jnp.float32),
        in_specs=[_full_spec((NH, WC)),
                  _full_spec((1, WC)),
                  _full_spec((1, WC)),
                  _full_spec((WC, WC)),
                  _full_spec((K * WC, WC)),
                  _full_spec((1, WC))],
        out_specs=_full_spec((NH, WC)),
    )(x_cl, gamma_t, beta_t, g_mat, w_mat, bias_t)


def stage_b_call(z_flat, gamma_t, beta_t, g_mat, w_mat, bias_t, *, eps):
    M, CT = z_flat.shape
    return pl.pallas_call(
        make_stage_b_kernel(eps),
        out_shape=jax.ShapeDtypeStruct((M, CT), jnp.float32),
        in_specs=[_full_spec((M, CT)),
                  _full_spec((1, CT)),
                  _full_spec((1, CT)),
                  _full_spec((CT, CT)),
                  _full_spec((CT, CT)),
                  _full_spec((1, CT))],
        out_specs=_full_spec((M, CT)),
    )(z_flat, gamma_t, beta_t, g_mat, w_mat, bias_t)


# ---------------------------------------------------------------------------
# One-time parameter staging (hoisted out of the jitted forward)
# ---------------------------------------------------------------------------
def prepare_params(params, B, T, H, W, C, heads, K=3):
    Cg = C // heads
    P = K // 2
    N = B * T
    M = B * H * W

    w2d = np.asarray(params["w2d"], np.float32)          # (C, Cg, K, K)
    w1d = np.asarray(params["w1d"], np.float32)          # (C, Cg, K)
    g2d = np.asarray(params["g2d"], np.float32).reshape(C)
    b2d = np.asarray(params["b2d"], np.float32).reshape(C)
    g1d = np.asarray(params["g1d"], np.float32).reshape(C)
    b1d = np.asarray(params["b1d"], np.float32).reshape(C)
    bias2d = np.asarray(params["bias2d"], np.float32).reshape(C)
    bias1d = np.asarray(params["bias1d"], np.float32).reshape(C)

    # Stage A banded conv matrix, lanes = (w, c).  Rows stacked kh-major:
    #   WA[kh*(W*C) + w'*C + ci, w*C + co] = w2d[co, ci_local, kh, kw],  w' = w + kw - P.
    wa = np.zeros((K, W, C, W, C), np.float32)
    for co in range(C):
        grp = co // Cg
        for cil in range(Cg):
            ci = grp * Cg + cil
            for kh in range(K):
                for kw in range(K):
                    for w in range(W):
                        wp = w + kw - P
                        if 0 <= wp < W:
                            wa[kh, wp, ci, w, co] = w2d[co, cil, kh, kw]
    wa = wa.reshape(K * W * C, W * C)

    # Stage B banded block-diagonal conv matrix, lanes = (c, t):
    #   WB[ci*T + t', co*T + t] = w1d[co, ci_local, kt],  t' = t + kt - P.
    wb = np.zeros((C, T, C, T), np.float32)
    for co in range(C):
        grp = co // Cg
        for cil in range(Cg):
            ci = grp * Cg + cil
            for kt in range(K):
                for t in range(T):
                    tp = t + kt - P
                    if 0 <= tp < T:
                        wb[ci, tp, co, t] = w1d[co, cil, kt]
    wb = wb.reshape(C * T, C * T)

    # BN group-reduction matrices (1/count folded in): a single (2, lanes) x (lanes, lanes)
    # matmul turns per-lane sums into per-channel means broadcast back to every lane.
    lane_a = np.arange(W * C)
    ga = (lane_a[:, None] % C == lane_a[None, :] % C).astype(np.float32) / float(N * H * W)
    lane_b = np.arange(C * T)
    gb = (lane_b[:, None] // T == lane_b[None, :] // T).astype(np.float32) / float(M * T)

    return dict(
        w_a=jnp.asarray(wa, jnp.bfloat16),
        w_b=jnp.asarray(wb, jnp.bfloat16),
        g_a=jnp.asarray(ga),
        g_b=jnp.asarray(gb),
        gamma_a=jnp.asarray(np.tile(g2d, W)[None, :]),
        beta_a=jnp.asarray(np.tile(b2d, W)[None, :]),
        bias_a=jnp.asarray(np.tile(bias2d, W)[None, :]),
        gamma_b=jnp.asarray(np.repeat(g1d, T)[None, :]),
        beta_b=jnp.asarray(np.repeat(b1d, T)[None, :]),
        bias_b=jnp.asarray(np.repeat(bias1d, T)[None, :]),
    )


# ---------------------------------------------------------------------------
# Full forward (matches DECOUPLED.forward exactly, including the .view mixing)
# ---------------------------------------------------------------------------
@functools.partial(jax.jit, static_argnames=("K", "eps"))
def decoupled_forward(x, prep, K=3, eps=1e-5):
    B, T, H, W, C = x.shape
    N = B * T
    M = B * H * W

    # x.view(B*T, C, H, W): pure row-major reinterpretation; then NCHW -> channels-last
    # (one XLA transpose) presented lane-dense as (N*H, W*C).
    x_nchw = x.reshape(N, C, H * W)
    x_cl = jnp.transpose(x_nchw, (0, 2, 1)).reshape(N * H, W * C)

    y_cl = stage_a_call(x_cl, prep["gamma_a"], prep["beta_a"], prep["g_a"],
                        prep["w_a"], prep["bias_a"], H=H, K=K, eps=eps)

    # channels-last -> NCHW flat order (second XLA transpose); x.view(B*H*W, C, T) is then a
    # free row-major reshape, consumed by stage B directly as lane-dense (M, C*T).
    y_flat = jnp.transpose(y_cl.reshape(N, H * W, C), (0, 2, 1)).reshape(M, C * T)

    z_flat = stage_b_call(y_flat, prep["gamma_b"], prep["beta_b"], prep["g_b"],
                          prep["w_b"], prep["bias_b"], eps=eps)

    # x.view(B, T, H, W, C): free reshape of the (M, C, T) buffer.
    return z_flat.reshape(B, T, H, W, C)


# ---------------------------------------------------------------------------
# Pure-JAX (XLA) reference for verification.
# ---------------------------------------------------------------------------
def reference_forward(x, params, heads, K=3, eps=1e-5):
    B, T, H, W, C = x.shape
    x = x.reshape(B * T, C, H, W)
    mean = x.mean(axis=(0, 2, 3), keepdims=True)
    var = ((x - mean) ** 2).mean(axis=(0, 2, 3), keepdims=True)
    x = (x - mean) / jnp.sqrt(var + eps) * params["g2d"].reshape(1, C, 1, 1) \
        + params["b2d"].reshape(1, C, 1, 1)
    x = jax.lax.conv_general_dilated(
        x, params["w2d"], window_strides=(1, 1), padding="SAME",
        feature_group_count=heads,
        dimension_numbers=("NCHW", "OIHW", "NCHW")) + params["bias2d"].reshape(1, C, 1, 1)
    x = x.reshape(B * H * W, C, T)
    mean = x.mean(axis=(0, 2), keepdims=True)
    var = ((x - mean) ** 2).mean(axis=(0, 2), keepdims=True)
    x = (x - mean) / jnp.sqrt(var + eps) * params["g1d"].reshape(1, C, 1) \
        + params["b1d"].reshape(1, C, 1)
    x = jax.lax.conv_general_dilated(
        x, params["w1d"], window_strides=(1,), padding="SAME",
        feature_group_count=heads,
        dimension_numbers=("NCH", "OIH", "NCH")) + params["bias1d"].reshape(1, C, 1)
    return x.reshape(B, T, H, W, C)


if __name__ == "__main__":
    B, T, H, W, C, heads, K = 2, 8, 8, 8, 32, 4, 3
    Cg = C // heads
    key = jax.random.PRNGKey(0)
    ks = jax.random.split(key, 9)
    x = jax.random.normal(ks[0], (B, T, H, W, C), jnp.float32)
    params = dict(
        g2d=1.0 + 0.1 * jax.random.normal(ks[1], (1, C), jnp.float32),
        b2d=0.1 * jax.random.normal(ks[2], (1, C), jnp.float32),
        w2d=0.1 * jax.random.normal(ks[3], (C, Cg, K, K), jnp.float32),
        bias2d=0.1 * jax.random.normal(ks[4], (1, C), jnp.float32),
        g1d=1.0 + 0.1 * jax.random.normal(ks[5], (1, C), jnp.float32),
        b1d=0.1 * jax.random.normal(ks[6], (1, C), jnp.float32),
        w1d=0.1 * jax.random.normal(ks[7], (C, Cg, K), jnp.float32),
        bias1d=0.1 * jax.random.normal(ks[8], (1, C), jnp.float32),
    )

    # Hoisted out of the jitted forward: banded conv matrices, BN group matrices, tiled vectors.
    prep = prepare_params(params, B, T, H, W, C, heads, K)

    out = decoupled_forward(x, prep, K=K, eps=1e-5)
    out = jax.block_until_ready(out)
    assert out.shape == (B, T, H, W, C)

    ref = jax.block_until_ready(reference_forward(x, params, heads, K))
    # bf16 matmul operands (f32 accumulation) + single-pass variance => slightly looser tolerance.
    np.testing.assert_allclose(np.asarray(out), np.asarray(ref), rtol=3e-2, atol=3e-2)

    print("KERNEL_OK")
</pallas_src>

<mosaic_0001>
module attributes {stable_mosaic.version = 11 : i64} {
  func.func @kernel(%arg0: memref<128x256xf32, #tpu.memory_space<vmem>>, %arg1: memref<1x256xf32, #tpu.memory_space<vmem>>, %arg2: memref<1x256xf32, #tpu.memory_space<vmem>>, %arg3: memref<256x256xf32, #tpu.memory_space<vmem>>, %arg4: memref<768x256xbf16, #tpu.memory_space<vmem>>, %arg5: memref<1x256xf32, #tpu.memory_space<vmem>>, %arg6: memref<128x256xf32, #tpu.memory_space<vmem>>) attributes {dimension_semantics = [], scalar_prefetch = 0 : i64, scratch_operands = 0 : i64, tpu.core_type = #tpu.core_type<tc>} {
    %c0 = arith.constant 0 : index
    %c0_0 = arith.constant 0 : index
    %0 = vector.load %arg0[%c0, %c0_0] : memref<128x256xf32, #tpu.memory_space<vmem>>, vector<128x256xf32>
    %cst = arith.constant dense<0.000000e+00> : vector<256xf32>
    %1 = vector.multi_reduction <add>, %0, %cst [0] : vector<128x256xf32> to vector<256xf32>
    %2 = vector.shape_cast %1 : vector<256xf32> to vector<1x256xf32>
    %3 = arith.mulf %0, %0 : vector<128x256xf32>
    %cst_1 = arith.constant dense<0.000000e+00> : vector<256xf32>
    %4 = vector.multi_reduction <add>, %3, %cst_1 [0] : vector<128x256xf32> to vector<256xf32>
    %5 = vector.shape_cast %4 : vector<256xf32> to vector<1x256xf32>
    %6 = tpu.concatenate %2, %5 in 0 : vector<1x256xf32>, vector<1x256xf32> -> vector<2x256xf32>
    %c0_2 = arith.constant 0 : index
    %c0_3 = arith.constant 0 : index
    %7 = vector.load %arg3[%c0_2, %c0_3] : memref<256x256xf32, #tpu.memory_space<vmem>>, vector<256x256xf32>
    %cst_4 = arith.constant dense<0.000000e+00> : vector<2x256xf32>
    %8 = tpu.matmul %6, %7, %cst_4 {dimension_numbers = #tpu.dot_dimension_numbers<[1], [0], [0], [1], [0, 0, 1, 1], [], []>} : vector<2x256xf32>, vector<256x256xf32>, vector<2x256xf32> -> vector<2x256xf32>
    %9 = vector.extract_strided_slice %8 {offsets = [0, 0], sizes = [1, 256], strides = [1, 1]} : vector<2x256xf32> to vector<1x256xf32>
    %10 = vector.extract_strided_slice %8 {offsets = [1, 0], sizes = [1, 256], strides = [1, 1]} : vector<2x256xf32> to vector<1x256xf32>
    %11 = arith.mulf %9, %9 : vector<1x256xf32>
    %12 = arith.subf %10, %11 : vector<1x256xf32>
    %c0_5 = arith.constant 0 : index
    %c0_6 = arith.constant 0 : index
    %13 = vector.load %arg1[%c0_5, %c0_6] : memref<1x256xf32, #tpu.memory_space<vmem>>, vector<1x256xf32>
    %cst_7 = arith.constant 9.99999974E-6 : f32
    %14 = vector.broadcast %cst_7 : f32 to vector<1x256xf32>
    %15 = arith.addf %12, %14 : vector<1x256xf32>
    %16 = math.rsqrt %15 : vector<1x256xf32>
    %17 = arith.mulf %13, %16 : vector<1x256xf32>
    %c0_8 = arith.constant 0 : index
    %c0_9 = arith.constant 0 : index
    %18 = vector.load %arg2[%c0_8, %c0_9] : memref<1x256xf32, #tpu.memory_space<vmem>>, vector<1x256xf32>
    %19 = arith.mulf %9, %17 : vector<1x256xf32>
    %20 = arith.subf %18, %19 : vector<1x256xf32>
    %21 = vector.broadcast %17 : vector<1x256xf32> to vector<128x256xf32>
    %22 = arith.mulf %0, %21 : vector<128x256xf32>
    %23 = vector.broadcast %20 : vector<1x256xf32> to vector<128x256xf32>
    %24 = arith.addf %22, %23 : vector<128x256xf32>
    %25 = arith.truncf %24 : vector<128x256xf32> to vector<128x256xbf16>
    %26 = tpu.iota {dimensions = array<i32: 0>} : vector<128x1xi32>
    %c8_i32 = arith.constant 8 : i32
    %c0_i32 = arith.constant 0 : i32
    %27 = arith.cmpi eq, %c8_i32, %c0_i32 : i32
    %c1_i32 = arith.constant 1 : i32
    %28 = arith.select %27, %c1_i32, %c8_i32 : i32
    %29 = vector.broadcast %28 : i32 to vector<128x1xi32>
    %30 = arith.remsi %26, %29 : vector<128x1xi32>
    %c0_i32_10 = arith.constant 0 : i32
    %31 = vector.broadcast %c0_i32_10 : i32 to vector<128x1xi32>
    %32 = arith.cmpi ne, %30, %31 : vector<128x1xi32>
    %c0_i32_11 = arith.constant 0 : i32
    %33 = vector.broadcast %c0_i32_11 : i32 to vector<128x1xi32>
    %34 = arith.cmpi slt, %30, %33 : vector<128x1xi32>
    %c0_i32_12 = arith.constant 0 : i32
    %35 = arith.cmpi slt, %28, %c0_i32_12 : i32
    %36 = vector.broadcast %35 : i1 to vector<128x1xi1>
    %37 = vector.broadcast %36 : vector<128x1xi1> to vector<128x1xi1>
    %38 = arith.xori %34, %37 : vector<128x1xi1>
    %39 = arith.andi %38, %32 : vector<128x1xi1>
    %40 = vector.broadcast %28 : i32 to vector<128x1xi32>
    %41 = arith.addi %30, %40 : vector<128x1xi32>
    %42 = arith.select %39, %41, %30 : vector<128x1xi1>, vector<128x1xi32>
    %cst_13 = arith.constant 0.000000e+00 : bf16
    %43 = vector.broadcast %cst_13 : bf16 to vector<1x256xbf16>
    %44 = vector.extract_strided_slice %25 {offsets = [0, 0], sizes = [127, 256], strides = [1, 1]} : vector<128x256xbf16> to vector<127x256xbf16>
    %45 = tpu.concatenate %43, %44 in 0 : vector<1x256xbf16>, vector<127x256xbf16> -> vector<128x256xbf16>
    %c-1_i32 = arith.constant -1 : i32
    %46 = vector.broadcast %c-1_i32 : i32 to vector<128x1xi32>
    %47 = arith.addi %42, %46 : vector<128x1xi32>
    %c0_i32_14 = arith.constant 0 : i32
    %48 = vector.broadcast %c0_i32_14 : i32 to vector<128x1xi32>
    %49 = arith.cmpi sge, %47, %48 : vector<128x1xi32>
    %50 = arith.extui %49 : vector<128x1xi1> to vector<128x1xi32>
    %51 = arith.sitofp %50 : vector<128x1xi32> to vector<128x1xf32>
    %52 = arith.truncf %51 : vector<128x1xf32> to vector<128x1xbf16>
    %53 = vector.broadcast %52 : vector<128x1xbf16> to vector<128x256xbf16>
    %54 = arith.mulf %45, %53 : vector<128x256xbf16>
    %55 = vector.extract_strided_slice %25 {offsets = [1, 0], sizes = [127, 256], strides = [1, 1]} : vector<128x256xbf16> to vector<127x256xbf16>
    %56 = tpu.concatenate %55, %43 in 0 : vector<127x256xbf16>, vector<1x256xbf16> -> vector<128x256xbf16>
    %c1_i32_15 = arith.constant 1 : i32
    %57 = vector.broadcast %c1_i32_15 : i32 to vector<128x1xi32>
    %58 = arith.addi %42, %57 : vector<128x1xi32>
    %c8_i32_16 = arith.constant 8 : i32
    %59 = vector.broadcast %c8_i32_16 : i32 to vector<128x1xi32>
    %60 = arith.cmpi slt, %58, %59 : vector<128x1xi32>
    %61 = arith.extui %60 : vector<128x1xi1> to vector<128x1xi32>
    %62 = arith.sitofp %61 : vector<128x1xi32> to vector<128x1xf32>
    %63 = arith.truncf %62 : vector<128x1xf32> to vector<128x1xbf16>
    %64 = vector.broadcast %63 : vector<128x1xbf16> to vector<128x256xbf16>
    %65 = arith.mulf %56, %64 : vector<128x256xbf16>
    %66 = tpu.concatenate %54, %25, %65 in 1 : vector<128x256xbf16>, vector<128x256xbf16>, vector<128x256xbf16> -> vector<128x768xbf16>
    %c0_17 = arith.constant 0 : index
    %c0_18 = arith.constant 0 : index
    %67 = vector.load %arg4[%c0_17, %c0_18] : memref<768x256xbf16, #tpu.memory_space<vmem>>, vector<768x256xbf16>
    %cst_19 = arith.constant dense<0.000000e+00> : vector<128x256xf32>
    %68 = tpu.matmul %66, %67, %cst_19 {dimension_numbers = #tpu.dot_dimension_numbers<[1], [0], [0], [1], [0, 0, 1, 1], [], []>} : vector<128x768xbf16>, vector<768x256xbf16>, vector<128x256xf32> -> vector<128x256xf32>
    %c0_20 = arith.constant 0 : index
    %c0_21 = arith.constant 0 : index
    %69 = vector.load %arg5[%c0_20, %c0_21] : memref<1x256xf32, #tpu.memory_space<vmem>>, vector<1x256xf32>
    %70 = vector.broadcast %69 : vector<1x256xf32> to vector<128x256xf32>
    %71 = arith.addf %68, %70 : vector<128x256xf32>
    %c0_22 = arith.constant 0 : index
    %c0_23 = arith.constant 0 : index
    %72 = vector.load %arg6[%c0_22, %c0_23] : memref<128x256xf32, #tpu.memory_space<vmem>>, vector<128x256xf32>
    tpu.vector_store %arg6[%c0_22, %c0_23], %71 {strides = array<i32>} : memref<128x256xf32, #tpu.memory_space<vmem>>, vector<128x256xf32>,
    return
  }
}

module attributes {stable_mosaic.version = 11 : i64} {
  func.func @kernel(%arg0: memref<128x256xf32, #tpu.memory_space<vmem>>, %arg1: memref<1x256xf32, #tpu.memory_space<vmem>>, %arg2: memref<1x256xf32, #tpu.memory_space<vmem>>, %arg3: memref<256x256xf32, #tpu.memory_space<vmem>>, %arg4: memref<256x256xbf16, #tpu.memory_space<vmem>>, %arg5: memref<1x256xf32, #tpu.memory_space<vmem>>, %arg6: memref<128x256xf32, #tpu.memory_space<vmem>>) attributes {dimension_semantics = [], scalar_prefetch = 0 : i64, scratch_operands = 0 : i64, tpu.core_type = #tpu.core_type<tc>} {
    %c0 = arith.constant 0 : index
    %c0_0 = arith.constant 0 : index
    %0 = vector.load %arg0[%c0, %c0_0] : memref<128x256xf32, #tpu.memory_space<vmem>>, vector<128x256xf32>
    %cst = arith.constant dense<0.000000e+00> : vector<256xf32>
    %1 = vector.multi_reduction <add>, %0, %cst [0] : vector<128x256xf32> to vector<256xf32>
    %2 = vector.shape_cast %1 : vector<256xf32> to vector<1x256xf32>
    %3 = arith.mulf %0, %0 : vector<128x256xf32>
    %cst_1 = arith.constant dense<0.000000e+00> : vector<256xf32>
    %4 = vector.multi_reduction <add>, %3, %cst_1 [0] : vector<128x256xf32> to vector<256xf32>
    %5 = vector.shape_cast %4 : vector<256xf32> to vector<1x256xf32>
    %6 = tpu.concatenate %2, %5 in 0 : vector<1x256xf32>, vector<1x256xf32> -> vector<2x256xf32>
    %c0_2 = arith.constant 0 : index
    %c0_3 = arith.constant 0 : index
    %7 = vector.load %arg3[%c0_2, %c0_3] : memref<256x256xf32, #tpu.memory_space<vmem>>, vector<256x256xf32>
    %cst_4 = arith.constant dense<0.000000e+00> : vector<2x256xf32>
    %8 = tpu.matmul %6, %7, %cst_4 {dimension_numbers = #tpu.dot_dimension_numbers<[1], [0], [0], [1], [0, 0, 1, 1], [], []>} : vector<2x256xf32>, vector<256x256xf32>, vector<2x256xf32> -> vector<2x256xf32>
    %9 = vector.extract_strided_slice %8 {offsets = [0, 0], sizes = [1, 256], strides = [1, 1]} : vector<2x256xf32> to vector<1x256xf32>
    %10 = vector.extract_strided_slice %8 {offsets = [1, 0], sizes = [1, 256], strides = [1, 1]} : vector<2x256xf32> to vector<1x256xf32>
    %11 = arith.mulf %9, %9 : vector<1x256xf32>
    %12 = arith.subf %10, %11 : vector<1x256xf32>
    %c0_5 = arith.constant 0 : index
    %c0_6 = arith.constant 0 : index
    %13 = vector.load %arg1[%c0_5, %c0_6] : memref<1x256xf32, #tpu.memory_space<vmem>>, vector<1x256xf32>
    %cst_7 = arith.constant 9.99999974E-6 : f32
    %14 = vector.broadcast %cst_7 : f32 to vector<1x256xf32>
    %15 = arith.addf %12, %14 : vector<1x256xf32>
    %16 = math.rsqrt %15 : vector<1x256xf32>
    %17 = arith.mulf %13, %16 : vector<1x256xf32>
    %c0_8 = arith.constant 0 : index
    %c0_9 = arith.constant 0 : index
    %18 = vector.load %arg2[%c0_8, %c0_9] : memref<1x256xf32, #tpu.memory_space<vmem>>, vector<1x256xf32>
    %19 = arith.mulf %9, %17 : vector<1x256xf32>
    %20 = arith.subf %18, %19 : vector<1x256xf32>
    %21 = vector.broadcast %17 : vector<1x256xf32> to vector<128x256xf32>
    %22 = arith.mulf %0, %21 : vector<128x256xf32>
    %23 = vector.broadcast %20 : vector<1x256xf32> to vector<128x256xf32>
    %24 = arith.addf %22, %23 : vector<128x256xf32>
    %25 = arith.truncf %24 : vector<128x256xf32> to vector<128x256xbf16>
    %c0_10 = arith.constant 0 : index
    %c0_11 = arith.constant 0 : index
    %26 = vector.load %arg4[%c0_10, %c0_11] : memref<256x256xbf16, #tpu.memory_space<vmem>>, vector<256x256xbf16>
    %cst_12 = arith.constant dense<0.000000e+00> : vector<128x256xf32>
    %27 = tpu.matmul %25, %26, %cst_12 {dimension_numbers = #tpu.dot_dimension_numbers<[1], [0], [0], [1], [0, 0, 1, 1], [], []>} : vector<128x256xbf16>, vector<256x256xbf16>, vector<128x256xf32> -> vector<128x256xf32>
    %c0_13 = arith.constant 0 : index
    %c0_14 = arith.constant 0 : index
    %28 = vector.load %arg5[%c0_13, %c0_14] : memref<1x256xf32, #tpu.memory_space<vmem>>, vector<1x256xf32>
    %29 = vector.broadcast %28 : vector<1x256xf32> to vector<128x256xf32>
    %30 = arith.addf %27, %29 : vector<128x256xf32>
    %c0_15 = arith.constant 0 : index
    %c0_16 = arith.constant 0 : index
    %31 = vector.load %arg6[%c0_15, %c0_16] : memref<128x256xf32, #tpu.memory_space<vmem>>, vector<128x256xf32>
    tpu.vector_store %arg6[%c0_15, %c0_16], %30 {strides = array<i32>} : memref<128x256xf32, #tpu.memory_space<vmem>>, vector<128x256xf32>,
    return
  }
}

</mosaic_0001>

<bundles_post_ra>
// kernel: decoupled_forward.2
= control target key start
LH: loop header
LB: loop body
LE: loop exit
PB: predicated region body
PF: predicated region fallthrough
CT: control target
= control target key end

     0   :  { %vm172_vm0 = vcmask 1040384   ;;  %s4175_s3 = inlined_call_operand.vmem [shape: f32[256,256], index: 3, kind: input, shape index: {}]   ;;  %s4176_s0 = inlined_call_operand.vmem [shape: f32[128,256], index: 0, kind: input, shape index: {}]   ;;  %s4177_s4 = inlined_call_operand.vmem [shape: bf16[768,256], index: 4, kind: input, shape index: {}]   ;;  %s4178_s1 = inlined_call_operand.vmem [shape: f32[1,256], index: 1, kind: input, shape index: {}]   ;;  %s4179_s2 = inlined_call_operand.vmem [shape: f32[1,256], index: 2, kind: input, shape index: {}]   ;;  %s4180_s5 = inlined_call_operand.vmem [shape: f32[1,256], index: 5, kind: input, shape index: {}]   ;;  %s4181_s6 = inlined_call_operand.vmem [shape: f32[128,256], index: 6, kind: output, shape index: {}]  }
   0x1   :  { %v176_v0 = vld [vmem:[%s4175_s3 + $0x8] sm:$0xff]  ;;  %v178_v1 = vld [vmem:[%s4175_s3 + $0x18] sm:$0xff]  ;;  %v175_v2 = vld [vmem:[%s4175_s3] sm:$0xff] }
   0x2   :  { %v2159_v3 = vpack.c.bf16 %v178_v1, %v176_v0  ;;  %v177_v4 = vld [vmem:[%s4175_s3 + $0x10] sm:$0xff]  ;;  %v180_v5 = vld [vmem:[%s4175_s3 + $0x28] sm:$0xff]  ;;  %v182_v6 = vld [vmem:[%s4175_s3 + $0x38] sm:$0xff] }
   0x3   :  { %v2161_v7 = vpack.c.bf16 %v177_v4, %v175_v2  ;;  %v2163_v8 = vpack.c.bf16 %v182_v6, %v180_v5  ;;  %v179_v9 = vld [vmem:[%s4175_s3 + $0x20] sm:$0xff]  ;;  %v181_v10 = vld [vmem:[%s4175_s3 + $0x30] sm:$0xff]  ;;  %v184_v11 = vld [vmem:[%s4175_s3 + $0x48] sm:$0xff] }
   0x4   :  { %2160 = vmatprep.subr.bf16.mxu0 %v2159_v3  ;;  %v186_v12 = vld [vmem:[%s4175_s3 + $0x58] sm:$0xff]  ;;  %v2165_v13 = vpack.c.bf16 %v181_v10, %v179_v9  ;;  %v183_v15 = vld [vmem:[%s4175_s3 + $0x40] sm:$0xff]  ;;  %v185_v16 = vld [vmem:[%s4175_s3 + $0x50] sm:$0xff] }
   0x5   :  { %2162 = vmatpush1.bf16.msra.mxu0 %v2161_v7  ;;  %v2167_v14 = vpack.c.bf16 %v186_v12, %v184_v11  ;;  %v188_v17 = vld [vmem:[%s4175_s3 + $0x68] sm:$0xff]  ;;  %v190_v18 = vld [vmem:[%s4175_s3 + $0x78] sm:$0xff]  ;;  %v2169_v19 = vpack.c.bf16 %v185_v16, %v183_v15  ;;  %v187_v21 = vld [vmem:[%s4175_s3 + $0x60] sm:$0xff] }
   0x6   :  { %2164 = vmatprep.subr.bf16.mxu0 %v2163_v8  ;;  %v2171_v20 = vpack.c.bf16 %v190_v18, %v188_v17  ;;  %v189_v22 = vld [vmem:[%s4175_s3 + $0x70] sm:$0xff]  ;;  %v192_v23 = vld [vmem:[%s4175_s3 + $0x88] sm:$0xff]  ;;  %v194_v24 = vld [vmem:[%s4175_s3 + $0x98] sm:$0xff] }
   0x7   :  { %v2173_v25 = vpack.c.bf16 %v189_v22, %v187_v21  ;;  %v2175_v26 = vpack.c.bf16 %v194_v24, %v192_v23  ;;  %v191_v27 = vld [vmem:[%s4175_s3 + $0x80] sm:$0xff]  ;;  %v193_v28 = vld [vmem:[%s4175_s3 + $0x90] sm:$0xff]  ;;  %v196_v29 = vld [vmem:[%s4175_s3 + $0xa8] sm:$0xff] }
   0x8   :  { %v198_v30 = vld [vmem:[%s4175_s3 + $0xb8] sm:$0xff]  ;;  %v2177_v31 = vpack.c.bf16 %v193_v28, %v191_v27  ;;  %v195_v33 = vld [vmem:[%s4175_s3 + $0xa0] sm:$0xff]  ;;  %v197_v34 = vld [vmem:[%s4175_s3 + $0xb0] sm:$0xff] }
   0x9   :  { %2166 = vmatpush1.bf16.msra.mxu0 %v2165_v13  ;;  %v2179_v32 = vpack.c.bf16 %v198_v30, %v196_v29  ;;  %v200_v35 = vld [vmem:[%s4175_s3 + $0xc8] sm:$0xff]  ;;  %v202_v36 = vld [vmem:[%s4175_s3 + $0xd8] sm:$0xff]  ;;  %v2181_v37 = vpack.c.bf16 %v197_v34, %v195_v33  ;;  %v199_v38 = vld [vmem:[%s4175_s3 + $0xc0] sm:$0xff] }
   0xa   :  { %2168 = vmatprep.subr.bf16.mxu0 %v2167_v14  ;;  %v201_v39 = vld [vmem:[%s4175_s3 + $0xd0] sm:$0xff]  ;;  %v2183_v40 = vpack.c.bf16 %v202_v36, %v200_v35  ;;  %v204_v41 = vld [vmem:[%s4175_s3 + $0xe8] sm:$0xff]  ;;  %v27_v43 = vld [vmem:[%s4176_s0 + $0x18] sm:$0xff] }
   0xb   :  { %v25_v42 = vld [vmem:[%s4176_s0 + $0x8] sm:$0xff]  ;;  %v206_v44 = vld [vmem:[%s4175_s3 + $0xf8] sm:$0xff]  ;;  %v101_v49 = vmul.f32 %v27_v43, %v27_v43  ;;  %v2185_v51 = vpack.c.bf16 %v201_v39, %v199_v38  ;;  %v203_v55 = vld [vmem:[%s4175_s3 + $0xe0] sm:$0xff] }
   0xc   :  { %v29_v45 = vld [vmem:[%s4176_s0 + $0x28] sm:$0xff]  ;;  %v31_v46 = vld [vmem:[%s4176_s0 + $0x38] sm:$0xff]  ;;  %v77_v47 = vadd.f32 %v27_v43, %v25_v42  ;;  %v99_v48 = vmul.f32 %v25_v42, %v25_v42  ;;  %v2187_v54 = vpack.c.bf16 %v206_v44, %v204_v41  ;;  %v205_v56 = vld [vmem:[%s4175_s3 + $0xf0] sm:$0xff] }
   0xd   :  { %2170 = vmatpush1.bf16.msra.mxu0 %v2169_v19  ;;  %v103_v50 = vmul.f32 %v29_v45, %v29_v45  ;;  %v33_v52 = vld [vmem:[%s4176_s0 + $0x48] sm:$0xff]  ;;  %v105_v57 = vmul.f32 %v31_v46, %v31_v46  ;;  %v210_v60 = vld [vmem:[%s4175_s3 + $0x118] sm:$0xff]  ;;  %v24_v1 = vld [vmem:[%s4176_s0] sm:$0xff]  ;;  %v2189_v3 = vpack.c.bf16 %v205_v56, %v203_v55 }
   0xe   :  { %2172 = vmatprep.subr.bf16.mxu0 %v2171_v20  ;;  %v78_v53 = vadd.f32 %v77_v47, %v29_v45  ;;  %v151_v58 = vadd.f32 %v101_v49, %v99_v48  ;;  %v208_v59 = vld [vmem:[%s4175_s3 + $0x108] sm:$0xff]  ;;  %v35_v61 = vld [vmem:[%s4176_s0 + $0x58] sm:$0xff]  ;;  %v107_v63 = vmul.f32 %v33_v52, %v33_v52  ;;  %v26_v2 = vld [vmem:[%s4176_s0 + $0x10] sm:$0xff]  ;;  %v98_v19 = vmul.f32 %v24_v1, %v24_v1 }
   0xf   :  { %v207_v4 = vld [vmem:[%s4175_s3 + $0x100] sm:$0xff]  ;;  %v37_v5 = vld [vmem:[%s4176_s0 + $0x68] sm:$0xff]  ;;  %v56_v7 = vadd.f32 %v26_v2, %v24_v1  ;;  %v2191_v8 = vpack.c.bf16 %v210_v60, %v208_v59  ;;  %v209_v9 = vld [vmem:[%s4175_s3 + $0x110] sm:$0xff]  ;;  %v109_v11 = vmul.f32 %v35_v61, %v35_v61  ;;  %v100_v20 = vmul.f32 %v26_v2, %v26_v2 }
  0x10   :  { %v79_v62 = vadd.f32 %v78_v53, %v31_v46  ;;  %v152_v0 = vadd.f32 %v151_v58, %v103_v50  ;;  %v212_v10 = vld [vmem:[%s4175_s3 + $0x128] sm:$0xff]  ;;  %v28_v13 = vld [vmem:[%s4176_s0 + $0x20] sm:$0xff]  ;;  %v214_v14 = vld [vmem:[%s4175_s3 + $0x138] sm:$0xff]  ;;  %v111_v23 = vmul.f32 %v37_v5, %v37_v5 }
  0x11   :  { %2174 = vmatpush1.bf16.msra.mxu0 %v2173_v25  ;;  %v2678_v15 = vld [vmem:[%s4175_s3 + $0x120] sm:$0xff]  ;;  %v39_v16 = vld [vmem:[%s4176_s0 + $0x78] sm:$0xff]  ;;  %v57_v18 = vadd.f32 %v56_v7, %v28_v13  ;;  %v2686_v21 = vld [vmem:[%s4175_s3 + $0x130] sm:$0xff]  ;;  %v102_v33 = vmul.f32 %v28_v13, %v28_v13  ;;  %v2195_v34 = vpack.c.bf16 %v214_v14, %v212_v10  ;;  %v130_v46 = vadd.f32 %v100_v20, %v98_v19 }
  0x12   :  { %2176 = vmatprep.subr.bf16.mxu0 %v2175_v26  ;;  %v80_v6 = vadd.f32 %v79_v62, %v33_v52  ;;  %v153_v12 = vadd.f32 %v152_v0, %v105_v57  ;;  %v41_v22 = vld [vmem:[%s4176_s0 + $0x88] sm:$0xff]  ;;  %v30_v25 = vld [vmem:[%s4176_s0 + $0x30] sm:$0xff]  ;;  %v2193_v26 = vpack.c.bf16 %v209_v9, %v207_v4  ;;  %v2702_v28 = vld [vmem:[%s4175_s3 + $0x158] sm:$0xff]  ;;  %v113_v35 = vmul.f32 %v39_v16, %v39_v16 }
  0x13   :  { %v2697_v27 = vld [vmem:[%s4175_s3 + $0x148] sm:$0xff]  ;;  %v43_v29 = vld [vmem:[%s4176_s0 + $0x98] sm:$0xff]  ;;  %v2719_v39 = vld [vmem:[%s4175_s3 + $0x140] sm:$0xff]  ;;  %v104_v45 = vmul.f32 %v30_v25, %v30_v25  ;;  %v2197_v48 = vpack.c.bf16 %v2686_v21, %v2678_v15  ;;  %v115_v49 = vmul.f32 %v41_v22, %v41_v22  ;;  %v131_v57 = vadd.f32 %v130_v46, %v102_v33 }
  0x14   :  { %v81_v17 = vadd.f32 %v80_v6, %v35_v61  ;;  %v154_v24 = vadd.f32 %v153_v12, %v107_v63  ;;  %v2323_v38 = vld [vmem:[%s4177_s4 + $0x100] ss:$8 sps:$4 sm:$0xff]   ;;  %v34_v43 = vld [vmem:[%s4176_s0 + $0x50] sm:$0xff]  ;;  %v2199_v59 = vpack.c.bf16 %v2702_v28, %v2697_v27  ;;  %v47_v60 = vld [vmem:[%s4176_s0 + $0xb8] sm:$0xff]  ;;  %v117_v61 = vmul.f32 %v43_v29, %v43_v29 }
  0x15   :  { %2178 = vmatpush1.bf16.msra.mxu0 %v2177_v31  ;;  %v32_v31 = vld [vmem:[%s4176_s0 + $0x40] sm:$0xff]  ;;  %v45_v41 = vld [vmem:[%s4176_s0 + $0xa8] sm:$0xff]  ;;  %v2324_v47 = vld [vmem:[%s4177_s4 + $0x114] ss:$8 sps:$4 sm:$0xff]   ;;  %v108_v7 = vmul.f32 %v34_v43, %v34_v43 }
  0x16   :  { %2180 = vmatprep.subr.bf16.mxu0 %v2179_v32  ;;  %v82_v30 = vadd.f32 %v81_v17, %v37_v5  ;;  %v58_v32 = vadd.f32 %v57_v18, %v30_v25  ;;  %v155_v36 = vadd.f32 %v154_v24, %v109_v11  ;;  %v106_v52 = vmul.f32 %v32_v31, %v32_v31  ;;  %v2743_v53 = vld [vmem:[%s4175_s3 + $0x168] sm:$0xff]  ;;  %v2326_v58 = vld [vmem:[%s4177_s4 + $0x110] ss:$8 sps:$4 sm:$0xff]   ;;  %v2764_v0 = vld [vmem:[%s4175_s3 + $0x160] sm:$0xff] }
  0x17   :  { %v2327_v63 = vld [vmem:[%s4177_s4 + $0x124] ss:$8 sps:$4 sm:$0xff]   ;;  %v2769_v1 = vld [vmem:[%s4175_s3 + $0x170] sm:$0xff]  ;;  %v119_v10 = vmul.f32 %v45_v41, %v45_v41  ;;  %v2329_v13 = vld [vmem:[%s4177_s4 + $0x120] ss:$8 sps:$4 sm:$0xff]  }
  0x18   :  { %v83_v42 = vadd.f32 %v82_v30, %v39_v16  ;;  %v59_v44 = vadd.f32 %v58_v32, %v32_v31  ;;  %v156_v50 = vadd.f32 %v155_v36, %v111_v23  ;;  %v49_v2 = vld [vmem:[%s4176_s0 + $0xc8] sm:$0xff]  ;;  %v38_v4 = vld [vmem:[%s4176_s0 + $0x70] sm:$0xff]  ;;  %v40_v5 = vld [vmem:[%s4176_s0 + $0x80] sm:$0xff] }
  0x19   :  { %2182 = vmatpush1.bf16.msra.mxu0 %v2181_v37  ;;  %v2321_v37 = vld [vmem:[%s4177_s4 + $0x104] ss:$8 sps:$4 sm:$0xff]   ;;  %v226_v15 = vld [vmem:[%s4175_s3 + $0x198] sm:$0xff]  ;;  %v2802_v24 = vld [vmem:[%s4176_s0 + $0x90] sm:$0xff]  ;;  %v112_v31 = vmul.f32 %v38_v4, %v38_v4 }
  0x1a   :  { %2184 = vmatprep.subr.bf16.mxu0 %v2183_v40  ;;  %v2724_v40 = vld [vmem:[%s4175_s3 + $0x150] sm:$0xff]  ;;  %1769 = vmatprep.subr.bf16.mxu1 %v2321_v37  ;;  %v84_v55 = vadd.f32 %v83_v42, %v41_v22  ;;  %v60_v56 = vadd.f32 %v59_v44, %v34_v43  ;;  %v157_v62 = vadd.f32 %v156_v50, %v113_v35  ;;  %v224_v14 = vld [vmem:[%s4175_s3 + $0x188] sm:$0xff]  ;;  %v51_v16 = vld [vmem:[%s4176_s0 + $0xd8] sm:$0xff] }
  0x1b   :  { %1770 = vmatpush1.bf16.msra.mxu1 %v2323_v38  ;;  %v2201_v9 = vpack.c.bf16 %v2724_v40, %v2719_v39  ;;  %v2333_v20 = vld [vmem:[%s4177_s4 + $0x134] ss:$8 sps:$4 sm:$0xff]   ;;  %v121_v22 = vmul.f32 %v47_v60, %v47_v60  ;;  %v223_v25 = vld [vmem:[%s4175_s3 + $0x180] sm:$0xff]  ;;  %v53_v27 = vld [vmem:[%s4176_s0 + $0xe8] sm:$0xff]  ;;  %v123_v35 = vmul.f32 %v49_v2, %v49_v2  ;;  %v114_v37 = vmul.f32 %v40_v5, %v40_v5 }
  0x1c   :  { %1771 = vmatprep.subr.bf16.mxu1 %v2324_v47  ;;  %v158_v11 = vadd.f32 %v157_v62, %v115_v49  ;;  %v2335_v33 = vld [vmem:[%s4177_s4 + $0x130] ss:$8 sps:$4 sm:$0xff]   ;;  %v228_v38 = vld [vmem:[%s4175_s3 + $0x1a8] sm:$0xff]  ;;  %v2207_v44 = vpack.c.bf16 %v226_v15, %v224_v14 }
  0x1d   :  { %2186 = vmatpush1.bf16.msra.mxu0 %v2185_v51  ;;  %v36_v51 = vld [vmem:[%s4176_s0 + $0x60] sm:$0xff]  ;;  %v230_v39 = vld [vmem:[%s4175_s3 + $0x1b8] sm:$0xff]  ;;  %v2836_v47 = vld [vmem:[%s4176_s0 + $0xb0] sm:$0xff] }
  0x1e   :  { %2188 = vmatprep.subr.bf16.mxu0 %v2187_v54  ;;  %v2748_v54 = vld [vmem:[%s4175_s3 + $0x178] sm:$0xff]  ;;  %v61_v6 = vadd.f32 %v60_v56, %v36_v51  ;;  %v110_v12 = vmul.f32 %v36_v51, %v36_v51  ;;  %v159_v23 = vadd.f32 %v158_v11, %v117_v61  ;;  %v229_v49 = vld [vmem:[%s4175_s3 + $0x1b0] sm:$0xff] }
  0x1f   :  { %1772 = vmatpush1.bf16.msra.mxu1 %v2326_v58  ;;  %v2203_v21 = vpack.c.bf16 %v2748_v54, %v2743_v53  ;;  %v55_v40 = vld [vmem:[%s4176_s0 + $0xf8] sm:$0xff] }
  0x20   :  { %v62_v18 = vadd.f32 %v61_v6, %v38_v4  ;;  %1773 = vmatprep.subr.bf16.mxu1 %v2327_v63  ;;  %v160_v36 = vadd.f32 %v159_v23, %v119_v10  ;;  %v231_v4 = vld [vmem:[%s4175_s3 + $0x1c0] sm:$0xff]  ;;  %v238_v14 = vld [vmem:[%s4175_s3 + $0x1f8] sm:$0xff] }
  0x21   :  { %2190 = vmatpush1.bf16.msra.mxu0 %v2189_v3  ;;  %v85_v3 = vadd.f32 %v84_v55, %v43_v29  ;;  %v2816_v29 = vld [vmem:[%s4176_s0 + $0xa0] sm:$0xff]  ;;  %v127_v55 = vmul.f32 %v53_v27, %v53_v27 }
  0x22   :  { %2192 = vmatprep.subr.bf16.mxu0 %v2191_v8  ;;  %v132_v8 = vadd.f32 %v131_v57, %v104_v45  ;;  %v63_v30 = vadd.f32 %v62_v18, %v40_v5  ;;  %v125_v45 = vmul.f32 %v51_v16, %v51_v16  ;;  %v161_v46 = vadd.f32 %v160_v36, %v121_v22  ;;  %v2850_v57 = vld [vmem:[%s4176_s0 + $0xc0] sm:$0xff]  ;;  %v233_v5 = vld [vmem:[%s4175_s3 + $0x1d0] sm:$0xff] }
  0x23   :  { %v86_v17 = vadd.f32 %v85_v3, %v45_v41  ;;  %1774 = vmatpush1.bf16.msra.mxu1 %v2329_v13  ;;  %v118_v58 = vmul.f32 %v2816_v29, %v2816_v29  ;;  %v2864_v3 = vld [vmem:[%s4176_s0 + $0xd0] sm:$0xff]  ;;  %v236_v13 = vld [vmem:[%s4175_s3 + $0x1e8] sm:$0xff] }
  0x24   :  { %v133_v19 = vadd.f32 %v132_v8, %v106_v52  ;;  %v64_v42 = vadd.f32 %v63_v30, %v2802_v24  ;;  %1775 = vmatprep.subr.bf16.mxu1 %v2333_v20  ;;  %v116_v52 = vmul.f32 %v2802_v24, %v2802_v24  ;;  %v162_v56 = vadd.f32 %v161_v46, %v123_v35  ;;  %v237_v30 = vld [vmem:[%s4175_s3 + $0x1f0] sm:$0xff] }
  0x25   :  { %2194 = vmatpush1.bf16.msra.mxu0 %v2193_v26  ;;  %v225_v26 = vld [vmem:[%s4175_s3 + $0x190] sm:$0xff]  ;;  %v87_v28 = vadd.f32 %v86_v17, %v47_v60  ;;  %v234_v60 = vld [vmem:[%s4175_s3 + $0x1d8] sm:$0xff]  ;;  %v120_v8 = vmul.f32 %v2836_v47, %v2836_v47  ;;  %v122_v17 = vmul.f32 %v2850_v57, %v2850_v57  ;;  %v2219_v36 = vpack.c.bf16 %v238_v14, %v236_v13 }
  0x26   :  { %2196 = vmatprep.subr.bf16.mxu0 %v2195_v34  ;;  %v134_v32 = vadd.f32 %v133_v19, %v108_v7  ;;  %v2205_v34 = vpack.c.bf16 %v2769_v1, %v2764_v0  ;;  %v65_v51 = vadd.f32 %v64_v42, %v2816_v29  ;;  %v2209_v54 = vpack.c.bf16 %v225_v26, %v223_v25  ;;  %v2347_v13 = vld [vmem:[%s4177_s4 + $0x150] ss:$8 sps:$4 sm:$0xff]   ;;  %v2350_v14 = vld [vmem:[%s4177_s4 + $0x34] ss:$8 sps:$4 sm:$0xff]  }
  0x27   :  { %v88_v41 = vadd.f32 %v87_v28, %v49_v2  ;;  %1776 = vmatpush1.bf16.msra.mxu1 %v2335_v33  ;;  %v2211_v0 = vpack.c.bf16 %v230_v39, %v228_v38  ;;  %v129_v1 = vmul.f32 %v55_v40, %v55_v40  ;;  %v163_v2 = vadd.f32 %v162_v56, %v125_v45  ;;  %v235_v28 = vld [vmem:[%s4175_s3 + $0x1e0] sm:$0xff] }
  0x28   :  { %v135_v43 = vadd.f32 %v134_v32, %v110_v12  ;;  %v66_v62 = vadd.f32 %v65_v51, %v2836_v47  ;;  %v2878_v12 = vld [vmem:[%s4176_s0 + $0xe0] sm:$0xff]  ;;  %v124_v25 = vmul.f32 %v2864_v3, %v2864_v3 }
  0x29   :  { %2198 = vmatpush1.bf16.msra.mxu0 %v2197_v48  ;;  %v227_v48 = vld [vmem:[%s4175_s3 + $0x1a0] sm:$0xff]  ;;  %v89_v50 = vadd.f32 %v88_v41, %v51_v16  ;;  %v164_v11 = vadd.f32 %v163_v2, %v127_v55 }
  0x2a   :  { %2200 = vmatprep.subr.bf16.mxu0 %v2199_v59  ;;  %v136_v53 = vadd.f32 %v135_v43, %v112_v31  ;;  %v232_v59 = vld [vmem:[%s4175_s3 + $0x1c8] sm:$0xff]  ;;  %v67_v7 = vadd.f32 %v66_v62, %v2850_v57  ;;  %v2213_v10 = vpack.c.bf16 %v229_v49, %v227_v48 }
  0x2b   :  { %v90_v61 = vadd.f32 %v89_v50, %v53_v27  ;;  %v2215_v19 = vpack.c.bf16 %v234_v60, %v232_v59  ;;  %v165_v20 = vadd.f32 %v164_v11, %v129_v1  ;;  %v2217_v27 = vpack.c.bf16 %v233_v5, %v231_v4  ;;  %v2332_v43 = vld [vmem:[%s4177_s4 + $0x4] ss:$8 sps:$4 sm:$0xff]   ;;  %v2330_v2 = vld [vmem:[%s4177_s4] ss:$8 sps:$4 sm:$0xff]   ;;  %v2338_v4 = vld [vmem:[%s4177_s4 + $0x14] ss:$8 sps:$4 sm:$0xff]  }
  0x2c   :  { %v137_v63 = vadd.f32 %v136_v53, %v114_v37  ;;  %v68_v16 = vadd.f32 %v67_v7, %v2864_v3  ;;  %v2339_v7 = vld [vmem:[%s4177_s4 + $0x144] ss:$8 sps:$4 sm:$0xff]   ;;  %v2345_v11 = vld [vmem:[%s4177_s4 + $0x154] ss:$8 sps:$4 sm:$0xff]  }
  0x2d   :  { %2202 = vmatpush1.bf16.msra.mxu0 %v2201_v9  ;;  %v91_v6 = vadd.f32 %v90_v61, %v55_v40  ;;  %v166_v31 = vrot.slane %v165_v20, 4  ;;  %1777 = vmatprep.subr.bf16.mxu1 %v2339_v7 }
  0x2e   :  { %2204 = vmatprep.subr.bf16.mxu0 %v2203_v21  ;;  %v138_v9 = vadd.f32 %v137_v63, %v116_v52  ;;  %v2892_v21 = vld [vmem:[%s4176_s0 + $0xf0] sm:$0xff]  ;;  %v69_v23 = vadd.f32 %v68_v16, %v2878_v12  ;;  %v2351_v16 = vld [vmem:[%s4177_s4 + $0x164] ss:$8 sps:$4 sm:$0xff]  }
  0x2f   :  { %v92_v15 = vrot.slane %v91_v6, 4  ;;  %v167_v37 = vadd.f32 %v166_v31, %v165_v20  ;;  %v128_v40 = vmul.f32 %v2892_v21, %v2892_v21  ;;  %v2357_v20 = vld [vmem:[%s4177_s4 + $0x174] ss:$8 sps:$4 sm:$0xff]  }
  0x30   :  { %v139_v18 = vadd.f32 %v138_v9, %v118_v58  ;;  %v70_v33 = vadd.f32 %v69_v23, %v2892_v21  ;;  %v2344_v9 = vld [vmem:[%s4177_s4 + $0x24] ss:$8 sps:$4 sm:$0xff]   ;;  %v2362_v23 = vld [vmem:[%s4177_s4 + $0x54] ss:$8 sps:$4 sm:$0xff]  }
  0x31   :  { %2206 = vmatpush1.bf16.msra.mxu0 %v2205_v34  ;;  %v93_v22 = vadd.f32 %v92_v15, %v91_v6  ;;  %v126_v34 = vmul.f32 %v2878_v12, %v2878_v12  ;;  %v168_v42 = vrot.slane %v167_v37, 2  ;;  %v2336_v6 = vld [vmem:[%s4177_s4 + $0x10] ss:$8 sps:$4 sm:$0xff]   ;;  %v2369_v31 = vld [vmem:[%s4177_s4 + $0x194] ss:$8 sps:$4 sm:$0xff]  }
  0x32   :  { %2208 = vmatprep.subr.bf16.mxu0 %v2207_v44  ;;  %v140_v26 = vadd.f32 %v139_v18, %v120_v8  ;;  %v71_v39 = vrot.slane %v70_v33, 4  ;;  %v2221_v44 = vpack.c.bf16 %v237_v30, %v235_v28  ;;  %v2341_v8 = vld [vmem:[%s4177_s4 + $0x140] ss:$8 sps:$4 sm:$0xff]   ;;  %v2348_v15 = vld [vmem:[%s4177_s4 + $0x30] ss:$8 sps:$4 sm:$0xff]  }
  0x33   :  { %v94_v32 = vrot.slane %v93_v22, 2  ;;  %v169_v49 = vadd.f32 %v168_v42, %v167_v37  ;;  %1778 = vmatpush1.bf16.msra.mxu1 %v2341_v8  ;;  %v2356_v18 = vld [vmem:[%s4177_s4 + $0x44] ss:$8 sps:$4 sm:$0xff]   ;;  %v2366_v30 = vld [vmem:[%s4177_s4 + $0x60] ss:$8 sps:$4 sm:$0xff]  }
  0x34   :  { %v141_v35 = vadd.f32 %v140_v26, %v122_v17  ;;  %v72_v46 = vadd.f32 %v71_v39, %v70_v33  ;;  %1779 = vmatprep.subr.bf16.mxu1 %v2345_v11  ;;  %v2353_v17 = vld [vmem:[%s4177_s4 + $0x160] ss:$8 sps:$4 sm:$0xff]   ;;  %v2363_v26 = vld [vmem:[%s4177_s4 + $0x184] ss:$8 sps:$4 sm:$0xff]   ;;  %v2374_v33 = vld [vmem:[%s4177_s4 + $0x74] ss:$8 sps:$4 sm:$0xff]  }
  0x35   :  { %2210 = vmatpush1.bf16.msra.mxu0 %v2209_v54  ;;  %v95_v38 = vadd.f32 %v94_v32, %v93_v22  ;;  %v170_v53 = vrot.slane %v169_v49, 1  ;;  %v2359_v22 = vld [vmem:[%s4177_s4 + $0x170] ss:$8 sps:$4 sm:$0xff]   ;;  %v2368_v28 = vld [vmem:[%s4177_s4 + $0x64] ss:$8 sps:$4 sm:$0xff]  }
  0x36   :  { %2212 = vmatprep.subr.bf16.mxu0 %v2211_v0  ;;  %v142_v41 = vadd.f32 %v141_v35, %v124_v25  ;;  %v73_v50 = vrot.slane %v72_v46, 2  ;;  %v2360_v25 = vld [vmem:[%s4177_s4 + $0x50] ss:$8 sps:$4 sm:$0xff]   ;;  %v2375_v35 = vld [vmem:[%s4177_s4 + $0x1a4] ss:$8 sps:$4 sm:$0xff]  }
  0x37   :  { %v96_v45 = vrot.slane %v95_v38, 1  ;;  %v171_v56 = vadd.f32 %v170_v53, %v169_v49  ;;  %1780 = vmatpush1.bf16.msra.mxu1 %v2347_v13  ;;  %v2371_v32 = vld [vmem:[%s4177_s4 + $0x190] ss:$8 sps:$4 sm:$0xff]   ;;  %v2380_v37 = vld [vmem:[%s4177_s4 + $0x84] ss:$8 sps:$4 sm:$0xff]  }
  0x38   :  { %v143_v48 = vadd.f32 %v142_v41, %v126_v34  ;;  %v74_v54 = vadd.f32 %v73_v50, %v72_v46  ;;  %1781 = vmatprep.subr.bf16.mxu1 %v2351_v16  ;;  %v2372_v34 = vld [vmem:[%s4177_s4 + $0x70] ss:$8 sps:$4 sm:$0xff]   ;;  %v2381_v39 = vld [vmem:[%s4177_s4 + $0x1b4] ss:$8 sps:$4 sm:$0xff]   ;;  %v2390_v46 = vld [vmem:[%s4177_s4 + $0xa0] ss:$8 sps:$4 sm:$0xff]  }
  0x39   :  { %2214 = vmatpush1.bf16.msra.mxu0 %v2213_v10  ;;  %v97_v52 = vadd.f32 %v96_v45, %v95_v38  ;;  %v2342_v10 = vld [vmem:[%s4177_s4 + $0x20] ss:$8 sps:$4 sm:$0xff]   ;;  %v2384_v41 = vld [vmem:[%s4177_s4 + $0x90] ss:$8 sps:$4 sm:$0xff]   ;;  %v2386_v42 = vld [vmem:[%s4177_s4 + $0x94] ss:$8 sps:$4 sm:$0xff]  }
  0x3a   :  { %2216 = vmatprep.subr.bf16.mxu0 %v2215_v19  ;;  %v144_v51 = vadd.f32 %v143_v48, %v128_v40  ;;  %v75_v60 = vrot.slane %v74_v54, 1  ;;  %v2354_v19 = vld [vmem:[%s4177_s4 + $0x40] ss:$8 sps:$4 sm:$0xff]   ;;  %v2383_v40 = vld [vmem:[%s4177_s4 + $0x1b0] ss:$8 sps:$4 sm:$0xff]  }
  0x3b   :  { %v174_v59 = vsel %vm172_vm0, %v97_v52, %v171_v56  ;;  %1782 = vmatpush1.bf16.msra.mxu1 %v2353_v17  ;;  %v2378_v38 = vld [vmem:[%s4177_s4 + $0x80] ss:$8 sps:$4 sm:$0xff]   ;;  %v2392_v45 = vld [vmem:[%s4177_s4 + $0xa4] ss:$8 sps:$4 sm:$0xff]   ;;  %v2393_v48 = vld [vmem:[%s4177_s4 + $0x1d4] ss:$8 sps:$4 sm:$0xff]  }
  0x3c   :  { %v145_v55 = vrot.slane %v144_v51, 4  ;;  %303 = vmatprep.mubr.f32.mxu0 %v174_v59  ;;  %v76_v63 = vadd.f32 %v75_v60, %v74_v54  ;;  %1783 = vmatprep.subr.bf16.mxu1 %v2357_v20  ;;  %v2395_v49 = vld [vmem:[%s4177_s4 + $0x1d0] ss:$8 sps:$4 sm:$0xff]   ;;  %v2398_v50 = vld [vmem:[%s4177_s4 + $0xb4] ss:$8 sps:$4 sm:$0xff]  }
  0x3d   :  { %2218 = vmatpush1.bf16.msra.mxu0 %v2217_v27  ;;  %v2365_v27 = vld [vmem:[%s4177_s4 + $0x180] ss:$8 sps:$4 sm:$0xff]   ;;  %v2399_v52 = vld [vmem:[%s4177_s4 + $0x1e4] ss:$8 sps:$4 sm:$0xff]   ;;  %v2405_v56 = vld [vmem:[%s4177_s4 + $0x1f4] ss:$8 sps:$4 sm:$0xff]  }
  0x3e   :  { %2220 = vmatprep.subr.bf16.mxu0 %v2219_v36  ;;  %v146_v58 = vadd.f32 %v145_v55, %v144_v51  ;;  %v2377_v36 = vld [vmem:[%s4177_s4 + $0x1a0] ss:$8 sps:$4 sm:$0xff]   ;;  %v2396_v51 = vld [vmem:[%s4177_s4 + $0xb0] ss:$8 sps:$4 sm:$0xff]   ;;  %v2404_v54 = vld [vmem:[%s4177_s4 + $0xc4] ss:$8 sps:$4 sm:$0xff]  }
  0x3f   :  { %1784 = vmatpush1.bf16.msra.mxu1 %v2359_v22  ;;  %v2401_v53 = vld [vmem:[%s4177_s4 + $0x1e0] ss:$8 sps:$4 sm:$0xff]   ;;  %v2410_v59 = vld [vmem:[%s4177_s4 + $0xd4] ss:$8 sps:$4 sm:$0xff]   ;;  %v2408_v60 = vld [vmem:[%s4177_s4 + $0xd0] ss:$8 sps:$4 sm:$0xff]  }
  0x40   :  { %v147_v61 = vrot.slane %v146_v58, 2  ;;  %1785 = vmatprep.subr.bf16.mxu1 %v2363_v26  ;;  %v2402_v55 = vld [vmem:[%s4177_s4 + $0xc0] ss:$8 sps:$4 sm:$0xff]  }
  0x41   :  { %2222 = vmatpush1.bf16.msra.mxu0 %v2221_v44  ;;  %v2389_v44 = vld [vmem:[%s4177_s4 + $0x1c0] ss:$8 sps:$4 sm:$0xff]  }
  0x42   :  { %1656 = vmatprep.subr.bf16.mxu0 %v2332_v43  ;;  %v148_v62 = vadd.f32 %v147_v61, %v146_v58  ;;  %v2387_v43 = vld [vmem:[%s4177_s4 + $0x1c4] ss:$8 sps:$4 sm:$0xff]   ;;  %v2407_v58 = vld [vmem:[%s4177_s4 + $0x1f0] ss:$8 sps:$4 sm:$0xff]  }
  0x43   :  { %1786 = vmatpush1.bf16.msra.mxu1 %v2365_v27  ;;  %v2413_v61 = vld [vmem:[%s4177_s4 + $0x204] ss:$8 sps:$4 sm:$0xff]  }
  0x44   :  { %v149_v0 = vrot.slane %v148_v62, 1  ;;  %1787 = vmatprep.subr.bf16.mxu1 %v2369_v31 }
  0x46   :  { %v150_v1 = vadd.f32 %v149_v0, %v148_v62  ;;  %v2416_v62 = vld [vmem:[%s4177_s4 + $0xe4] ss:$8 sps:$4 sm:$0xff]   ;;  %v2422_v0 = vld [vmem:[%s4177_s4 + $0xf4] ss:$8 sps:$4 sm:$0xff]  }
  0x47   :  { %1788 = vmatpush1.bf16.msra.mxu1 %v2371_v32 }
  0x48   :  { %v173_v5 = vsel %vm172_vm0, %v76_v63, %v150_v1  ;;  %1789 = vmatprep.subr.bf16.mxu1 %v2375_v35  ;;  %v2414_v63 = vld [vmem:[%s4177_s4 + $0xe0] ss:$8 sps:$4 sm:$0xff]   ;;  %v2420_v1 = vld [vmem:[%s4177_s4 + $0xf0] ss:$8 sps:$4 sm:$0xff]  }
  0x49   :  { %304 = vmatmul.mubr.f32.vlgmr.msra.gmra.mrb[0].mxu0 %v173_v5 }
  0x4a   :  { %1657 = vmatpush1.bf16.msra.mxu0 %v2330_v2  ;;  %v331_v2 = vlaneseq }
  0x4b   :  { %1658 = vmatprep.subr.bf16.mxu0 %v2338_v4  ;;  %1790 = vmatpush1.bf16.msra.mxu1 %v2377_v36 }
  0x4c   :  { %1791 = vmatprep.subr.bf16.mxu1 %v2381_v39  ;;  %v3081_v4 = vshrl.u32 %v331_v2, 7 }
  0x4e   :  { %1659 = vmatpush1.bf16.msra.mxu0 %v2336_v6  ;;  %v3084_v5 = vadd.s32 96, %v3081_v4  ;;  %v3087_v6 = vadd.s32 104, %v3081_v4  ;;  %v3090_v7 = vadd.s32 112, %v3081_v4  ;;  %v3093_v8 = vadd.s32 120, %v3081_v4 }
  0x4f   :  { %1660 = vmatprep.subr.bf16.mxu0 %v2344_v9  ;;  %1792 = vmatpush1.bf16.msra.mxu1 %v2383_v40  ;;  %v3124_v31 = vadd.s32 24, %v3081_v4  ;;  %v3134_v35 = vadd.s32 40, %v3081_v4  ;;  %v481_v2 = vadd.s32 88, %v3081_v4 }
  0x50   :  { %1793 = vmatprep.subr.bf16.mxu1 %v2387_v43  ;;  %v574_v9 = vand.u32 7, %v3084_v5  ;;  %v588_v11 = vand.u32 7, %v3090_v7  ;;  %v595_v13 = vand.u32 7, %v3093_v8  ;;  %v320_v7 = vld [vmem:[%s4178_s1] sm:$0x3] }
  0x51   :  { %4208 = vst [vmem:[#allocation5_spill] sm:$0xff] %v3124_v31 }
  0x52   :  { %1661 = vmatpush1.bf16.msra.mxu0 %v2342_v10  ;;  %v581_v10 = vand.u32 7, %v3087_v6  ;;  %v994_v16 = vadd.s32 1, %v588_v11  ;;  %v995_v17 = vadd.s32 1, %v595_v13  ;;  %v839_v6 = vadd.s32 4294967295, %v588_v11 }
  0x53   :  { %1662 = vmatprep.subr.bf16.mxu0 %v2350_v14  ;;  %1794 = vmatpush1.bf16.msra.mxu1 %v2389_v44  ;;  %v992_v14 = vadd.s32 1, %v574_v9 }
  0x54   :  { %1795 = vmatprep.subr.bf16.mxu1 %v2393_v48  ;;  %vm1010_vm3 = vcmp.lt.s32.totalorder %v994_v16, 8  ;;  %vm1011_vm4 = vcmp.lt.s32.totalorder %v995_v17, 8 }
  0x55   :  { %vm1008_vm1 = vcmp.lt.s32.totalorder %v992_v14, 8 }
  0x56   :  { %1663 = vmatpush1.bf16.msra.mxu0 %v2348_v15  ;;  %v993_v15 = vadd.s32 1, %v581_v10 }
  0x57   :  { %1664 = vmatprep.subr.bf16.mxu0 %v2356_v18  ;;  %1796 = vmatpush1.bf16.msra.mxu1 %v2395_v49  ;;  %v4184_v18 = vmov 0.0   ;;  %v2495_v49 = vmov 1966171168  }
  0x58   :  { %1797 = vmatprep.subr.bf16.mxu1 %v2399_v52  ;;  %vm1009_vm2 = vcmp.lt.s32.totalorder %v993_v15, 8 }
  0x59   :  { %v2060_v20 = vsel %vm1009_vm2, 1.0, %v4184_v18 }
  0x5a   :  { %1665 = vmatpush1.bf16.msra.mxu0 %v2354_v19  ;;  %v2059_v19 = vsel %vm1008_vm1, 1.0, %v4184_v18 }
  0x5b   :  { %1666 = vmatprep.subr.bf16.mxu0 %v2362_v23  ;;  %1798 = vmatpush1.bf16.msra.mxu1 %v2401_v53  ;;  %v3109_v22 = vpack.c.bf16 %v2060_v20, %v2059_v19  ;;  %v2061_v23 = vsel %vm1010_vm3, 1.0, %v4184_v18 }
  0x5c   :  { %1799 = vmatprep.subr.bf16.mxu1 %v2405_v56 }
  0x5d   :  { %4205 = vst [vmem:[#allocation2_spill] sm:$0xff] %v3109_v22 }
  0x5e   :  { %1667 = vmatpush1.bf16.msra.mxu0 %v2360_v25  ;;  %v2062_v25 = vsel %vm1011_vm4, 1.0, %v4184_v18  ;;  %vm855_vm4 = vcmp.ge.s32.totalorder %v839_v6, 0 }
  0x5f   :  { %1668 = vmatprep.subr.bf16.mxu0 %v2368_v28  ;;  %1800 = vmatpush1.bf16.msra.mxu1 %v2407_v58  ;;  %v3113_v26 = vpack.c.bf16 %v2062_v25, %v2061_v23  ;;  %v3118_v28 = vadd.s32 8, %v3081_v4  ;;  %v567_v23 = vand.u32 7, %v481_v2 }
  0x60   :  { %1882 = vmatprep.subr.bf16.mxu1 %v2413_v61 }
  0x61   :  { %4206 = vst [vmem:[#allocation3_spill] sm:$0xff] %v3113_v26  ;;  %v4186_v40 = vand.u32 7, %v3118_v28 }
  0x62   :  { %1669 = vmatpush1.bf16.msra.mxu0 %v2366_v30  ;;  %v3121_v30 = vadd.s32 16, %v3081_v4 }
  0x63   :  { %1670 = vmatprep.subr.bf16.mxu0 %v2374_v33  ;;  %v826_v58 = vadd.s32 4294967295, %v4186_v40 }
  0x64   :  { %4207 = vst [vmem:[#allocation4_spill] sm:$0xff] %v3121_v30 }
  0x65   :  { %vm842_vm6 = vcmp.ge.s32.totalorder %v826_v58, 0 }
  0x66   :  { %1671 = vmatpush1.bf16.msra.mxu0 %v2372_v34  ;;  %v3131_v34 = vadd.s32 32, %v3081_v4 }
  0x67   :  { %1672 = vmatprep.subr.bf16.mxu0 %v2380_v37 }
  0x68   :  { %v518_v44 = vand.u32 7, %v3131_v34  ;;  %v991_v34 = vadd.s32 1, %v567_v23 }
  0x6a   :  { %1673 = vmatpush1.bf16.msra.mxu0 %v2378_v38  ;;  %v490_v38 = vand.u32 7, %v3081_v4  ;;  %v829_v61 = vadd.s32 4294967295, %v518_v44 }
  0x6b   :  { %1674 = vmatprep.subr.bf16.mxu0 %v2386_v42  ;;  %v4182_v42 = vand.u32 7, %v3124_v31 }
  0x6c   :  { %v825_v53 = vadd.s32 4294967295, %v490_v38  ;;  %vm845_vm9 = vcmp.ge.s32.totalorder %v829_v61, 0 }
  0x6e   :  { %1675 = vmatpush1.bf16.msra.mxu0 %v2384_v41  ;;  %v4183_v41 = vand.u32 7, %v3121_v30  ;;  %vm841_vm5 = vcmp.ge.s32.totalorder %v825_v53, 0  ;;  %v3186_v53 = vsub.s32 0, %v3081_v4 }
  0x6f   :  { %1676 = vmatprep.subr.bf16.mxu0 %v2392_v45  ;;  %v525_v45 = vand.u32 7, %v3134_v35 }
  0x70   :  { %4209 = vst [vmem:[#allocation6_spill] sm:$0xff] %v3186_v53 }
  0x72   :  { %1677 = vmatpush1.bf16.msra.mxu0 %v2390_v46  ;;  %v3146_v46 = vadd.s32 48, %v3081_v4 }
  0x73   :  { %1678 = vmatprep.subr.bf16.mxu0 %v2398_v50  ;;  %v329_v50 = vunpack.c.l.s4 %v2495_v49 }
  0x75   :  { %v330_v16 = vunpack.c.0.s8 %v329_v50 }
  0x76   :  { %1679 = vmatpush1.bf16.msra.mxu0 %v2396_v51  ;;  %v3150_v51 = vadd.s32 56, %v3081_v4 }
  0x77   :  { %1680 = vmatprep.subr.bf16.mxu0 %v2404_v54  ;;  %v3155_v54 = vadd.s32 64, %v3081_v4 }
  0x79   :  { %v546_v14 = vand.u32 7, %v3155_v54  ;;  %v837_v54 = vadd.s32 4294967295, %v574_v9 }
  0x7a   :  { %1681 = vmatpush1.bf16.msra.mxu0 %v2402_v55  ;;  %v3158_v55 = vadd.s32 72, %v3081_v4 }
  0x7b   :  { %1682 = vmatprep.subr.bf16.mxu0 %v2410_v59  ;;  %v827_v59 = vadd.s32 4294967295, %v4183_v41  ;;  %v833_v25 = vadd.s32 4294967295, %v546_v14  ;;  %vm853_vm2 = vcmp.ge.s32.totalorder %v837_v54, 0 }
  0x7c   :  { %v553_v15 = vand.u32 7, %v3158_v55 }
  0x7d   :  { %vm843_vm7 = vcmp.ge.s32.totalorder %v827_v59, 0  ;;  %vm849_vm13 = vcmp.ge.s32.totalorder %v833_v25, 0 }
  0x7e   :  { %1683 = vmatpush1.bf16.msra.mxu0 %v2408_v60  ;;  %v828_v60 = vadd.s32 4294967295, %v4182_v42  ;;  %v2039_v9 = vsel %vm849_vm13, 1.0, %v4184_v18  ;;  %vm1007_vm13 = vcmp.lt.s32.totalorder %v991_v34, 8  ;;  %v2474_v34 = vld [vmem:[%s4176_s0 + $0x38] sm:$0xff] }
  0x7f   :  { %1684 = vmatprep.subr.bf16.mxu0 %v2416_v62  ;;  %v830_v62 = vadd.s32 4294967295, %v525_v45 }
  0x80   :  { %vm844_vm8 = vcmp.ge.s32.totalorder %v828_v60, 0  ;;  %v838_v60 = vadd.s32 4294967295, %v581_v10  ;;  %v840_v10 = vadd.s32 4294967295, %v595_v13 }
  0x81   :  { %vm846_vm10 = vcmp.ge.s32.totalorder %v830_v62, 0 }
  0x82   :  { %1685 = vmatpush1.bf16.msra.mxu0 %v2414_v63  ;;  %v532_v63 = vand.u32 7, %v3146_v46  ;;  %v2034_v46 = vsel %vm844_vm8, 1.0, %v4184_v18  ;;  %v2036_v49 = vsel %vm846_vm10, 1.0, %v4184_v18  ;;  %vm854_vm3 = vcmp.ge.s32.totalorder %v838_v60, 0 }
  0x83   :  { %1686 = vmatprep.subr.bf16.mxu0 %v2422_v0  ;;  %v539_v0 = vand.u32 7, %v3150_v51  ;;  %v836_v51 = vadd.s32 4294967295, %v567_v23  ;;  %v2058_v60 = vsel %vm1007_vm13, 1.0, %v4184_v18 }
  0x84   :  { %v831_v17 = vadd.s32 4294967295, %v532_v63  ;;  %v986_v25 = vadd.s32 1, %v532_v63 }
  0x85   :  { %v832_v19 = vadd.s32 4294967295, %v539_v0  ;;  %vm852_vm1 = vcmp.ge.s32.totalorder %v836_v51, 0 }
  0x86   :  { %1687 = vmatpush1.bf16.msra.mxu0 %v2420_v1  ;;  %v480_v1 = vadd.s32 80, %v3081_v4  ;;  %vm847_vm11 = vcmp.ge.s32.totalorder %v831_v17, 0  ;;  %v984_v17 = vadd.s32 1, %v518_v44  ;;  %v2042_v11 = vsel %vm852_vm1, 1.0, %v4184_v18 }
  0x87   :  { %vm848_vm12 = vcmp.ge.s32.totalorder %v832_v19, 0  ;;  %v985_v19 = vadd.s32 1, %v525_v45  ;;  %v2043_v44 = vsel %vm853_vm2, 1.0, %v4184_v18  ;;  %v2044_v45 = vsel %vm854_vm3, 1.0, %v4184_v18 }
  0x88   :  { %v560_v20 = vand.u32 7, %v480_v1  ;;  %v2037_v1 = vsel %vm847_vm11, 1.0, %v4184_v18  ;;  %v2038_v5 = vsel %vm848_vm12, 1.0, %v4184_v18  ;;  %vm1002_vm8 = vcmp.lt.s32.totalorder %v986_v25, 8  ;;  %v2470_v25 = vld [vmem:[%s4176_s0 + $0x18] sm:$0xff] }
  0x89   :  { %vm976_vm1 = vcmask 1047552  }
  0x8a   :  { %v835_v50 = vadd.s32 4294967295, %v560_v20  ;;  %v990_v13 = vadd.s32 1, %v560_v20 }
  0x8c   :  { %vm851_vm15 = vcmp.ge.s32.totalorder %v835_v50, 0  ;;  %vm1006_vm12 = vcmp.lt.s32.totalorder %v990_v13, 8 }
  0x8d   :  { %v2041_v8 = vsel %vm851_vm15, 1.0, %v4184_v18 }
  0x8e   :  { %v3252_v6 = vpack.c.bf16 %v2042_v11, %v2041_v8  ;;  %v345_v8 = vld [vmem:[%s4179_s2] sm:$0x3]  ;;  %v2473_v11 = vld [vmem:[%s4176_s0 + $0x28] sm:$0xff] }
 0x11c   :  { %v3115_v27 = vpop.f32.mrb[0].mxu0 }
 0x11d   :  { %v310_v32 = vmul.f32 %v3115_v27, %v3115_v27  ;;  %v3128_v33 = vpop.f32.mrb[1].mxu0 }
 0x11e   :  { %v311_v36 = vmul.f32 %v3128_v33, %v3128_v33 }
 0x11f   :  { %v314_v37 = vrot.slane %v310_v32, 7  ;;  %v834_v32 = vadd.s32 4294967295, %v553_v15 }
 0x120   :  { %v315_v39 = vrot.slane %v311_v36, 7  ;;  %v3177_v36 = vsub.s32 %v330_v16, %v3081_v4 }
 0x121   :  { %v318_v43 = vsub.f32 %v3115_v27, %v314_v37  ;;  %v2031_v37 = vsel %vm841_vm5, 1.0, %v4184_v18  ;;  %vm850_vm14 = vcmp.ge.s32.totalorder %v834_v32, 0  ;;  %vm856_vm5 = vcmp.ge.s32.totalorder %v840_v10, 0 }
 0x122   :  { %v319_v48 = vsub.f32 %v3128_v33, %v315_v39  ;;  %v2032_v39 = vsel %vm842_vm6, 1.0, %v4184_v18  ;;  %v2040_v2 = vsel %vm850_vm14, 1.0, %v4184_v18  ;;  %vm1000_vm6 = vcmp.lt.s32.totalorder %v984_v17, 8 }
 0x123   :  { %v321_v52 = vadd.f32 1e-05, %v318_v43  ;;  %v2033_v43 = vsel %vm843_vm7, 1.0, %v4184_v18  ;;  %v3193_v58 = vpack.c.bf16 %v2032_v39, %v2031_v37  ;;  %v987_v37 = vadd.s32 1, %v539_v0 }
 0x124   :  { %v322_v56 = vadd.f32 1e-05, %v319_v48  ;;  %v2035_v48 = vsel %vm845_vm9, 1.0, %v4184_v18  ;;  %v3195_v59 = vpack.c.bf16 %v2034_v46, %v2033_v43  ;;  %v988_v39 = vadd.s32 1, %v546_v14 }
 0x125   :  { %2465 = vrsqrt.f32 %v321_v52  ;;  %v3199_v62 = vpack.c.bf16 %v2036_v49, %v2035_v48  ;;  %v989_v43 = vadd.s32 1, %v553_v15  ;;  %vm1001_vm7 = vcmp.lt.s32.totalorder %v985_v19, 8 }
 0x126   :  { %2467 = vrsqrt.f32 %v322_v56  ;;  %v3191_v56 = vsub.s32 1, %v3081_v4  ;;  %vm1003_vm9 = vcmp.lt.s32.totalorder %v987_v37, 8  ;;  %vm1004_vm10 = vcmp.lt.s32.totalorder %v988_v39, 8  ;;  %v2471_v37 = vld [vmem:[%s4176_s0] sm:$0xff] }
 0x127   :  { %vm1005_vm11 = vcmp.lt.s32.totalorder %v989_v43, 8  ;;  %v2045_v0 = vsel %vm855_vm4, 1.0, %v4184_v18  ;;  %v2046_v14 = vsel %vm856_vm5, 1.0, %v4184_v18  ;;  %v2051_v23 = vsel %vm1000_vm6, 1.0, %v4184_v18  ;;  %v2472_v43 = vld [vmem:[%s4176_s0 + $0x10] sm:$0xff] }
 0x128   :  { %4210 = vst [vmem:[#allocation7_spill] sm:$0xff] %v3191_v56  ;;  %v2052_v46 = vsel %vm1001_vm7, 1.0, %v4184_v18  ;;  %v2053_v48 = vsel %vm1002_vm8, 1.0, %v4184_v18  ;;  %v2054_v49 = vsel %vm1003_vm9, 1.0, %v4184_v18  ;;  %v2055_v50 = vsel %vm1004_vm10, 1.0, %v4184_v18 }
 0x129   :  { %v2056_v51 = vsel %vm1005_vm11, 1.0, %v4184_v18  ;;  %v3256_v10 = vadd.s32 1, %v490_v38  ;;  %v3258_v19 = vpack.c.bf16 %v2044_v45, %v2043_v44  ;;  %v2475_v44 = vld [vmem:[%s4176_s0 + $0x20] sm:$0xff]  ;;  %vm678_vm14 = vsmask.f32 256 }
 0x12a   :  { %vm3476_vm15 = vmand %vm172_vm0, %vm678_vm14  ;;  %vm913_vm0 = vsmask.f32 7424 }
 0x12b   :  { %4211 = vst [vmem:[#allocation8_spill] sm:$0xff] %v3256_v10  ;;  %vm3886_vm3 = vmand %vm976_vm1, %vm913_vm0 }
 0x12f   :  { %v2466_v52 = vpop.eup %2465 }
 0x130   :  { %v2468_v55 = vpop.eup %2467 }
 0x131   :  { %v327_v61 = vcombine.low %v2466_v52, %v2468_v55  ;;  %v2057_v55 = vsel %vm1006_vm12, 1.0, %v4184_v18 }
 0x132   :  { %v3272_v4 = vpack.c.bf16 %v2058_v60, %v2057_v55  ;;  %v2482_v60 = vld [vmem:[%s4176_s0 + $0x78] sm:$0xff] }
 0x133   :  { %v334_v16 = vrot.slane %v327_v61, %v3177_v36  ;;  %v3248_v61 = vpack.c.bf16 %v2038_v5, %v2037_v1  ;;  %v2469_v1 = vld [vmem:[%s4176_s0 + $0x8] sm:$0xff] }
 0x134   :  { %4212 = vst [vmem:[#allocation9_spill] sm:$0xff] %v3272_v4 }
 0x135   :  { %v335_v32 = vcombine.high %v334_v16, %v334_v16  ;;  %v3250_v16 = vpack.c.bf16 %v2040_v2, %v2039_v9  ;;  %v3268_v9 = vpack.c.bf16 %v2054_v49, %v2053_v48  ;;  %v3270_v2 = vpack.c.bf16 %v2056_v51, %v2055_v50  ;;  %v2478_v48 = vld [vmem:[%s4176_s0 + $0x58] sm:$0xff]  ;;  %v2479_v50 = vld [vmem:[%s4176_s0 + $0x40] sm:$0xff] }
 0x137   :  { %v342_v35 = vrot.slane %v335_v32, %v3177_v36 }
 0x139   :  { %v344_v63 = vmul.f32 %v342_v35, %v320_v7 }
 0x13b   :  { %v3231_v15 = vrot.slane %v344_v63, %v3186_v53  ;;  %v3234_v20 = vrot.slane %v344_v63, %v3191_v56  ;;  %v2476_v63 = vld [vmem:[%s4176_s0 + $0x30] sm:$0xff] }
 0x13d   :  { %v357_v52 = vmul.f32 %v3231_v15, %v3115_v27  ;;  %v358_v54 = vmul.f32 %v3234_v20, %v3128_v33  ;;  %v3260_v27 = vpack.c.bf16 %v2046_v14, %v2045_v0  ;;  %v3262_v33 = vpack.c.bf16 %v2052_v46, %v2051_v23  ;;  %v2477_v23 = vld [vmem:[%s4176_s0 + $0x48] sm:$0xff] }
 0x13e   :  { %v379_v5 = vmul.f32 %v2469_v1, %v3234_v20  ;;  %v381_v32 = vmul.f32 %v2470_v25, %v3234_v20  ;;  %v378_v39 = vmul.f32 %v2471_v37, %v3231_v15  ;;  %v380_v7 = vmul.f32 %v2472_v43, %v3231_v15  ;;  %v2483_v1 = vld [vmem:[%s4176_s0 + $0x60] sm:$0xff]  ;;  %v2484_v37 = vld [vmem:[%s4176_s0 + $0x70] sm:$0xff] }
 0x13f   :  { %v361_v17 = vcombine.low %v357_v52, %v358_v54  ;;  %v383_v13 = vmul.f32 %v2473_v11, %v3234_v20  ;;  %v385_v35 = vmul.f32 %v2474_v34, %v3234_v20  ;;  %v382_v45 = vmul.f32 %v2475_v44, %v3231_v15  ;;  %v2481_v54 = vld [vmem:[%s4176_s0 + $0x68] sm:$0xff]  ;;  %v2486_v44 = vld [vmem:[%s4176_s0 + $0x98] sm:$0xff] }
 0x140   :  { %v384_v0 = vmul.f32 %v2476_v63, %v3231_v15  ;;  %v387_v46 = vmul.f32 %v2477_v23, %v3234_v20  ;;  %v389_v49 = vmul.f32 %v2478_v48, %v3234_v20  ;;  %v386_v51 = vmul.f32 %v2479_v50, %v3231_v15  ;;  %v2485_v11 = vld [vmem:[%s4176_s0 + $0x88] sm:$0xff]  ;;  %v2487_v63 = vld [vmem:[%s4176_s0 + $0x80] sm:$0xff] }
 0x141   :  { %v368_v38 = vrot.slane %v361_v17, %v3177_v36  ;;  %v3327_v55 = vmul.f32 %v2481_v54, %v3234_v20  ;;  %v3333_v17 = vmul.f32 %v2482_v60, %v3234_v20  ;;  %v3345_v43 = vmul.f32 %v2484_v37, %v3231_v15  ;;  %v2488_v48 = vld [vmem:[%s4176_s0 + $0xa8] sm:$0xff] }
 0x142   :  { %v3351_v34 = vmul.f32 %v2485_v11, %v3234_v20  ;;  %v3367_v23 = vmul.f32 %v3231_v15, %v2802_v24  ;;  %v3373_v50 = vmul.f32 %v2488_v48, %v3234_v20  ;;  %v3393_v37 = vmul.f32 %v3231_v15, %v2836_v47  ;;  %v2490_v11 = vld [vmem:[%s4176_s0 + $0xc8] sm:$0xff] }
 0x143   :  { %v375_v14 = vrot.slane %v368_v38, %v3177_v36  ;;  %v2480_v36 = vld [vmem:[%s4176_s0 + $0x50] sm:$0xff]  ;;  %v3339_v38 = vmul.f32 %v2483_v1, %v3231_v15  ;;  %v3389_v1 = vmul.f32 %v3231_v15, %v2816_v29  ;;  %v3409_v29 = vmul.f32 %v3231_v15, %v2850_v57 }
 0x144   :  { %v388_v52 = vmul.f32 %v2480_v36, %v3231_v15  ;;  %v2489_v36 = vld [vmem:[%s4176_s0 + $0xb8] sm:$0xff]  ;;  %v3413_v47 = vmul.f32 %v3231_v15, %v2864_v3  ;;  %v2411_v3 = vld [vmem:[%s4177_s4 + $0x200] ss:$8 sps:$4 sm:$0xff]   ;;  %v3494_v26 = vmul.f32 %v3231_v15, %v2892_v21 }
 0x145   :  { %v377_v25 = vsub.f32 %v345_v8, %v375_v14  ;;  %v3357_v8 = vmul.f32 %v2486_v44, %v3234_v20  ;;  %v3363_v14 = vmul.f32 %v2487_v63, %v3231_v15  ;;  %v3379_v54 = vmul.f32 %v2489_v36, %v3234_v20 }
 0x146   :  { %v3399_v44 = vmul.f32 %v2490_v11, %v3234_v20 }
 0x147   :  { %v3382_v60 = vrot.slane %v377_v25, %v3186_v53  ;;  %v3385_v24 = vrot.slane %v377_v25, %v3191_v56  ;;  %v2491_v25 = vld [vmem:[%s4176_s0 + $0xd8] sm:$0xff] }
 0x148   :  { %v3405_v63 = vmul.f32 %v2491_v25, %v3234_v20 }
 0x149   :  { %v422_v48 = vadd.f32 %v3385_v24, %v379_v5  ;;  %v424_v36 = vadd.f32 %v3385_v24, %v381_v32  ;;  %v421_v11 = vadd.f32 %v3382_v60, %v378_v39  ;;  %v423_v42 = vadd.f32 %v3382_v60, %v380_v7 }
 0x14a   :  { %v426_v41 = vadd.f32 %v3385_v24, %v383_v13  ;;  %v428_v25 = vadd.f32 %v3385_v24, %v385_v35  ;;  %v425_v18 = vadd.f32 %v3382_v60, %v382_v45  ;;  %v427_v57 = vadd.f32 %v3382_v60, %v384_v0  ;;  %v2419_v13 = vld [vmem:[%s4177_s4 + $0x214] ss:$8 sps:$4 sm:$0xff]  }
 0x14b   :  { %v3423_v40 = vpack.c.bf16 %v424_v36, %v422_v48  ;;  %v3428_v5 = vpack.c.bf16 %v423_v42, %v421_v11  ;;  %v430_v32 = vadd.f32 %v3385_v24, %v387_v46  ;;  %v432_v39 = vadd.f32 %v3385_v24, %v389_v49 }
 0x14c   :  { %v3432_v7 = vpack.c.bf16 %v428_v25, %v426_v41  ;;  %v3437_v35 = vpack.c.bf16 %v427_v57, %v425_v18  ;;  %v429_v45 = vadd.f32 %v3382_v60, %v386_v51  ;;  %v431_v0 = vadd.f32 %v3382_v60, %v388_v52  ;;  %v2492_v41 = vld [vmem:[%s4176_s0 + $0xe8] sm:$0xff]  ;;  %v2493_v18 = vld [vmem:[%s4176_s0 + $0xf8] sm:$0xff] }
 0x14d   :  { %v4189_v48 = vshrl.u32 %v3423_v40, 16  ;;  %1801 = vmatprep.mubr.bf16.mxu1 %v3423_v40  ;;  %v4187_v42 = vshrl.u32 %v3428_v5, 16  ;;  %v3448_v46 = vmul.f32 %v2492_v41, %v3234_v20  ;;  %v3454_v49 = vmul.f32 %v2493_v18, %v3234_v20  ;;  %v2417_v41 = vld [vmem:[%s4177_s4 + $0x210] ss:$8 sps:$4 sm:$0xff]  }
 0x14e   :  { %v683_v51 = vshll.u32 %v3428_v5, 16  ;;  %1802 = vmatmul.mubr.bf16.vlgmr.msra.gmra.mrb[0].mxu1 %v3428_v5  ;;  %v4194_v52 = vshrl.u32 %v3432_v7, 16  ;;  %v694_v36 = vshrl.u32 %v3437_v35, 16  ;;  %v3462_v11 = vmul.f32 %v3231_v15, %v2878_v12 }
 0x14f   :  { %v690_v25 = vshll.u32 %v3423_v40, 16  ;;  %v682_v57 = vrot.slane %v4187_v42, 7  ;;  %1883 = vmatpush1.bf16.msra.mxu1 %v2411_v3  ;;  %1811 = vmatprep.mubr.bf16.mxu1 %v3432_v7  ;;  %v689_v18 = vrot.slane %v4189_v48, 7  ;;  %v2425_v42 = vld [vmem:[%s4177_s4 + $0x224] ss:$8 sps:$4 sm:$0xff]   ;;  %v697_v56 = vshll.u32 %v3437_v35, 16 }
 0x150   :  { %v704_v3 = vrot.slane %v4194_v52, 7  ;;  %1884 = vmatprep.subr.bf16.mxu1 %v2419_v13  ;;  %v696_v20 = vrot.slane %v694_v36, 7  ;;  %v3488_v48 = vpack.c.bf16 %v432_v39, %v430_v32  ;;  %v3490_v30 = vpack.c.bf16 %v431_v0, %v429_v45  ;;  %v2423_v32 = vld [vmem:[%s4177_s4 + $0x220] ss:$8 sps:$4 sm:$0xff]  }
 0x151   :  { %v692_v53 = vor.u32 %v690_v25, %v689_v18  ;;  %v685_v31 = vor.u32 %v683_v51, %v682_v57  ;;  %v914_v13 = vrot.slane %v683_v51, 1  ;;  %v4215_v22 = vshll.u32 %v3432_v7, 16 }
 0x152   :  { %v718_v52 = vshrl.u32 %v3488_v48, 16  ;;  %v699_v10 = vor.u32 %v697_v56, %v696_v20  ;;  %v721_v21 = vshll.u32 %v3488_v48, 16  ;;  %v4198_v15 = vshrl.u32 %v3490_v30, 16 }
 0x153   :  { %v707_v4 = vor.u32 %v4215_v22, %v704_v3  ;;  %1885 = vmatpush1.bf16.msra.mxu1 %v2417_v41  ;;  %v824_v39 = vsel %vm3476_vm15, 0, %v692_v53  ;;  %v823_v45 = vsel %vm3476_vm15, 0, %v685_v31  ;;  %v2428_v53 = vld [vmem:[%s4177_s4 + $0x234] ss:$8 sps:$4 sm:$0xff]  }
 0x154   :  { %1886 = vmatprep.subr.bf16.mxu1 %v2425_v42  ;;  %v898_v0 = vmul.bf16 %v3193_v58, %v824_v39  ;;  %v897_v22 = vmul.bf16 %v3193_v58, %v823_v45  ;;  %v3512_v51 = vrot.slane %v718_v52, 7  ;;  %v3520_v31 = vrot.slane %v4198_v15, 7 }
 0x155   :  { %v708_v41 = vsel %vm678_vm14, %v689_v18, %v707_v4  ;;  %v713_v42 = vshll.u32 %v3490_v30, 16  ;;  %v700_v12 = vsel %vm678_vm14, %v682_v57, %v699_v10  ;;  %v434_v58 = vadd.f32 %v3385_v24, %v3327_v55  ;;  %v2426_v55 = vld [vmem:[%s4177_s4 + $0x230] ss:$8 sps:$4 sm:$0xff]  }
 0x156   :  { %1688 = vmatprep.mubr.bf16.mxu0 %v898_v0  ;;  %1812 = vmatmul.mubr.bf16.gmra.mrb[4].mxu1 %v3437_v35  ;;  %v900_v4 = vmul.bf16 %v3195_v59, %v708_v41  ;;  %v436_v18 = vadd.f32 %v3385_v24, %v3333_v17  ;;  %v723_v39 = vor.u32 %v721_v21, %v3512_v51  ;;  %v4216_v45 = vand.u32 7, %v3118_v28 }
 0x157   :  { %v3537_v10 = vrot.slane %v690_v25, 1  ;;  %1887 = vmatpush1.bf16.msra.mxu1 %v2423_v32  ;;  %1689 = vmatmul.mubr.bf16.vlgmr.msra.gmra.mrb[4].mxu0 %v897_v22  ;;  %v433_v57 = vadd.f32 %v3382_v60, %v3339_v38  ;;  %v435_v17 = vadd.f32 %v3382_v60, %v3345_v43  ;;  %v715_v28 = vor.u32 %v713_v42, %v3520_v31  ;;  %v2431_v25 = vld [vmem:[%s4177_s4 + $0x244] ss:$8 sps:$4 sm:$0xff]  }
 0x158   :  { %v3535_v15 = vadd.s32 1, %v4216_v45  ;;  %v3549_v0 = vrot.slane %v697_v56, 1  ;;  %1821 = vmatprep.mubr.bf16.mxu1 %v3488_v48  ;;  %1698 = vmatprep.mubr.bf16.mxu0 %v900_v4  ;;  %v3555_v32 = vpack.c.bf16 %v436_v18, %v434_v58  ;;  %v724_v38 = vsel %vm678_vm14, %v704_v3, %v723_v39 }
 0x159   :  { %v438_v43 = vadd.f32 %v3385_v24, %v3351_v34  ;;  %v4217_v22 = vshrl.u32 %v3428_v5, 16  ;;  %1888 = vmatprep.subr.bf16.mxu1 %v2428_v53  ;;  %v3564_v56 = vpack.c.bf16 %v435_v17, %v433_v57  ;;  %v3567_v4 = vsel %vm678_vm14, %v696_v20, %v715_v28  ;;  %v2429_v5 = vld [vmem:[%s4177_s4 + $0x240] ss:$8 sps:$4 sm:$0xff]  }
 0x15a   :  { %v440_v45 = vadd.f32 %v3385_v24, %v3357_v8  ;;  %v899_v58 = vmul.bf16 %v3195_v59, %v700_v12  ;;  %v734_v3 = vshrl.u32 %v3555_v32, 16  ;;  %v902_v18 = vmul.bf16 %v3199_v62, %v724_v38  ;;  %v2432_v38 = vld [vmem:[%s4177_s4 + $0x250] ss:$8 sps:$4 sm:$0xff]  }
 0x15b   :  { %v3562_v41 = vor.u32 %v914_v13, %v4217_v22  ;;  %v437_v34 = vadd.f32 %v3382_v60, %v3363_v14  ;;  %1889 = vmatpush1.bf16.msra.mxu1 %v2426_v55  ;;  %v737_v20 = vshll.u32 %v3555_v32, 16  ;;  %v4204_v13 = vshrl.u32 %v3564_v56, 16  ;;  %v2434_v55 = vld [vmem:[%s4177_s4 + $0x254] ss:$8 sps:$4 sm:$0xff]  }
 0x15c   :  { %v3581_v53 = vpack.c.bf16 %v440_v45, %v438_v43  ;;  %v439_v59 = vadd.f32 %v3382_v60, %v3367_v23  ;;  %1890 = vmatprep.subr.bf16.mxu1 %v2431_v25  ;;  %v736_v8 = vrot.slane %v734_v3, 7  ;;  %v442_v14 = vadd.f32 %v3385_v24, %v3373_v50 }
 0x15d   :  { %v444_v12 = vadd.f32 %v3385_v24, %v3379_v54  ;;  %v441_v39 = vadd.f32 %v3382_v60, %v3389_v1  ;;  %v728_v23 = vrot.slane %v4204_v13, 7  ;;  %v729_v57 = vshll.u32 %v3564_v56, 16 }
 0x15e   :  { %v4199_v17 = vshrl.u32 %v3581_v53, 16  ;;  %v3600_v28 = vpack.c.bf16 %v439_v59, %v437_v34  ;;  %1822 = vmatmul.mubr.bf16.gmra.mrb[8].mxu1 %v3490_v30  ;;  %v739_v50 = vor.u32 %v737_v20, %v736_v8  ;;  %v443_v1 = vadd.f32 %v3382_v60, %v3393_v37  ;;  %v2437_v37 = vld [vmem:[%s4177_s4 + $0x264] ss:$8 sps:$4 sm:$0xff]  }
 0x15f   :  { %v3605_v54 = vpack.c.bf16 %v444_v12, %v442_v14  ;;  %v446_v25 = vadd.f32 %v3385_v24, %v3399_v44  ;;  %1891 = vmatpush1.bf16.msra.mxu1 %v2429_v5  ;;  %1699 = vmatmul.mubr.bf16.gmra.mrb[8].mxu0 %v899_v58  ;;  %v753_v22 = vshll.u32 %v3581_v53, 16  ;;  %v731_v34 = vor.u32 %v729_v57, %v728_v23 }
 0x160   :  { %v752_v43 = vrot.slane %v4199_v17, 7  ;;  %v4201_v45 = vshrl.u32 %v3600_v28, 16  ;;  %1831 = vmatprep.mubr.bf16.mxu1 %v3555_v32  ;;  %1708 = vmatprep.mubr.bf16.mxu0 %v902_v18  ;;  %v740_v44 = vsel %vm678_vm14, %v3512_v51, %v739_v50  ;;  %v3627_v5 = vpack.c.bf16 %v443_v1, %v441_v39 }
 0x161   :  { %v4200_v58 = vshrl.u32 %v3605_v54, 16  ;;  %v4218_v59 = vshll.u32 %v3432_v7, 16  ;;  %1892 = vmatprep.subr.bf16.mxu1 %v2434_v55  ;;  %v745_v18 = vshll.u32 %v3600_v28, 16  ;;  %v3638_v17 = vsel %vm678_vm14, %v3520_v31, %v731_v34 }
 0x162   :  { %v744_v12 = vrot.slane %v4201_v45, 7  ;;  %v755_v51 = vor.u32 %v753_v22, %v752_v43  ;;  %v901_v39 = vmul.bf16 %v3199_v62, %v3567_v4  ;;  %v4203_v55 = vshll.u32 %v3605_v54, 16 }
 0x163   :  { %v3631_v14 = vrot.slane %v4218_v59, 1  ;;  %v768_v50 = vrot.slane %v4200_v58, 7  ;;  %v4202_v1 = vshrl.u32 %v3627_v5, 16  ;;  %1893 = vmatpush1.bf16.msra.mxu1 %v2432_v38  ;;  %v2435_v59 = vld [vmem:[%s4177_s4 + $0x260] ss:$8 sps:$4 sm:$0xff]   ;;  %v448_v62 = vadd.f32 %v3385_v24, %v3405_v63 }
 0x164   :  { %v3652_v31 = vsel %vm678_vm14, %v736_v8, %v755_v51  ;;  %v747_v34 = vor.u32 %v745_v18, %v744_v12  ;;  %v445_v4 = vadd.f32 %v3382_v60, %v3409_v29  ;;  %1894 = vmatprep.subr.bf16.mxu1 %v2437_v37  ;;  %v761_v58 = vshll.u32 %v3627_v5, 16  ;;  %v2440_v51 = vld [vmem:[%s4177_s4 + $0x274] ss:$8 sps:$4 sm:$0xff]  }
 0x165   :  { %v760_v38 = vrot.slane %v4202_v1, 7  ;;  %v771_v45 = vor.u32 %v4203_v55, %v768_v50  ;;  %v447_v8 = vadd.f32 %v3382_v60, %v3413_v47  ;;  %v3673_v29 = vpack.c.bf16 %v448_v62, %v446_v25 }
 0x166   :  { %v3671_v63 = vsel %vm678_vm14, %v728_v23, %v747_v34  ;;  %v450_v37 = vadd.f32 %v3385_v24, %v3448_v46  ;;  %v452_v1 = vadd.f32 %v3385_v24, %v3454_v49  ;;  %1832 = vmatmul.mubr.bf16.gmra.mrb[12].mxu1 %v3564_v56  ;;  %v904_v55 = vmul.bf16 %v3248_v61, %v740_v44  ;;  %v2438_v46 = vld [vmem:[%s4177_s4 + $0x270] ss:$8 sps:$4 sm:$0xff]  }
 0x167   :  { %v3682_v47 = vsel %vm678_vm14, %v752_v43, %v771_v45  ;;  %v3684_v13 = vpack.c.bf16 %v447_v8, %v445_v4  ;;  %v763_v23 = vor.u32 %v761_v58, %v760_v38  ;;  %1895 = vmatpush1.bf16.msra.mxu1 %v2435_v59  ;;  %1709 = vmatmul.mubr.bf16.gmra.mrb[12].mxu0 %v901_v39  ;;  %v782_v24 = vshrl.u32 %v3673_v29, 16  ;;  %v2443_v45 = vld [vmem:[%s4177_s4 + $0x284] ss:$8 sps:$4 sm:$0xff]   ;;  %v2441_v4 = vld [vmem:[%s4177_s4 + $0x280] ss:$8 sps:$4 sm:$0xff]  }
 0x168   :  { %v3692_v49 = vpack.c.bf16 %v452_v1, %v450_v37  ;;  %v926_v25 = vrot.slane %v721_v21, 1  ;;  %v923_v43 = vrot.slane %v713_v42, 1  ;;  %1841 = vmatprep.mubr.bf16.mxu1 %v3581_v53  ;;  %1718 = vmatprep.mubr.bf16.mxu0 %v904_v55  ;;  %v903_v44 = vmul.bf16 %v3248_v61, %v3638_v17 }
 0x169   :  { %v774_v39 = vshrl.u32 %v3684_v13, 16  ;;  %v3706_v1 = vsel %vm678_vm14, %v744_v12, %v763_v23  ;;  %v449_v21 = vadd.f32 %v3382_v60, %v3462_v11  ;;  %1896 = vmatprep.subr.bf16.mxu1 %v2440_v51  ;;  %v784_v42 = vrot.slane %v782_v24, 7 }
 0x16a   :  { %v785_v55 = vshll.u32 %v3673_v29, 16  ;;  %v777_v59 = vshll.u32 %v3684_v13, 16  ;;  %v798_v34 = vshrl.u32 %v3692_v49, 16  ;;  %v451_v17 = vadd.f32 %v3382_v60, %v3494_v26 }
 0x16b   :  { %v776_v61 = vrot.slane %v774_v39, 7  ;;  %v3722_v11 = vsel %vm913_vm0, %v3562_v41, %v3549_v0  ;;  %v4219_v12 = vshrl.u32 %v3423_v40, 16  ;;  %1897 = vmatpush1.bf16.msra.mxu1 %v2438_v46  ;;  %v801_v51 = vshll.u32 %v3692_v49, 16 }
 0x16c   :  { %v800_v8 = vrot.slane %v798_v34, 7  ;;  %v787_v26 = vor.u32 %v785_v55, %v784_v42  ;;  %v4220_v60 = vshrl.u32 %v3432_v7, 16  ;;  %1898 = vmatprep.subr.bf16.mxu1 %v2443_v45  ;;  %v3738_v40 = vpack.c.bf16 %v451_v17, %v449_v21  ;;  %v2446_v7 = vld [vmem:[%s4177_s4 + $0x294] ss:$8 sps:$4 sm:$0xff]  }
 0x16d   :  { %v919_v62 = vor.u32 %v3537_v10, %v4219_v12  ;;  %v779_v10 = vor.u32 %v777_v59, %v776_v61  ;;  %v922_v23 = vor.u32 %v3549_v0, %v694_v36  ;;  %v906_v46 = vmul.bf16 %v3250_v16, %v3652_v31 }
 0x16e   :  { %v925_v41 = vor.u32 %v3631_v14, %v4220_v60  ;;  %v3755_v45 = vsel %vm678_vm14, %v768_v50, %v787_v26  ;;  %v803_v21 = vor.u32 %v801_v51, %v800_v8  ;;  %1842 = vmatmul.mubr.bf16.gmra.mrb[16].mxu1 %v3600_v28  ;;  %v905_v35 = vmul.bf16 %v3250_v16, %v3671_v63  ;;  %v2444_v50 = vld [vmem:[%s4177_s4 + $0x290] ss:$8 sps:$4 sm:$0xff]  }
 0x16f   :  { %v3744_v37 = vsel %vm913_vm0, %v919_v62, %v3631_v14  ;;  %v910_v36 = vmul.bf16 %v3258_v19, %v3755_v45  ;;  %v790_v0 = vshrl.u32 %v3738_v40, 16  ;;  %v3769_v31 = vsel %vm678_vm14, %v760_v38, %v779_v10  ;;  %1899 = vmatpush1.bf16.msra.mxu1 %v2441_v4  ;;  %1719 = vmatmul.mubr.bf16.gmra.mrb[16].mxu0 %v903_v44  ;;  %v2449_v38 = vld [vmem:[%s4177_s4 + $0x2a4] ss:$8 sps:$4 sm:$0xff]  }
 0x170   :  { %v3760_v14 = vsel %vm913_vm0, %v925_v41, %v926_v25  ;;  %v793_v17 = vshll.u32 %v3738_v40, 16  ;;  %v909_v16 = vmul.bf16 %v3258_v19, %v3769_v31  ;;  %v3778_v63 = vsel %vm678_vm14, %v784_v42, %v803_v21  ;;  %1851 = vmatprep.mubr.bf16.mxu1 %v3605_v54  ;;  %1728 = vmatprep.mubr.bf16.mxu0 %v906_v46 }
 0x171   :  { %v932_v12 = vrot.slane %v737_v20, 1  ;;  %v792_v44 = vrot.slane %v790_v0, 7  ;;  %v912_v62 = vmul.bf16 %v3260_v27, %v3778_v63  ;;  %v3791_v4 = vsel %vm913_vm0, %v922_v23, %v923_v43  ;;  %1900 = vmatprep.subr.bf16.mxu1 %v2446_v7 }
 0x172   :  { %v931_v42 = vor.u32 %v926_v25, %v718_v52  ;;  %v908_v20 = vmul.bf16 %v3252_v6, %v3682_v47  ;;  %v4221_v8 = vshrl.u32 %v3490_v30, 16  ;;  %v929_v60 = vrot.slane %v729_v57, 1  ;;  %v2447_v30 = vld [vmem:[%s4177_s4 + $0x2a0] ss:$8 sps:$4 sm:$0xff]  }
 0x173   :  { %v937_v41 = vor.u32 %v932_v12, %v734_v3  ;;  %v795_v10 = vor.u32 %v793_v17, %v792_v44  ;;  %v938_v48 = vrot.slane %v753_v22, 1  ;;  %v935_v52 = vrot.slane %v745_v18, 1  ;;  %1901 = vmatpush1.bf16.msra.mxu1 %v2444_v50 }
 0x174   :  { %v928_v26 = vor.u32 %v923_v43, %v4221_v8  ;;  %v3804_v23 = vsel %vm913_vm0, %v931_v42, %v932_v12  ;;  %v4222_v3 = vshrl.u32 %v3564_v56, 16  ;;  %v4223_v25 = vshll.u32 %v3605_v54, 16  ;;  %1902 = vmatprep.subr.bf16.mxu1 %v2449_v38  ;;  %v2452_v56 = vld [vmem:[%s4177_s4 + $0x2b4] ss:$8 sps:$4 sm:$0xff]  }
 0x175   :  { %v1057_v57 = vmul.bf16 %v3262_v33, %v3804_v23  ;;  %v3823_v18 = vsel %vm678_vm14, %v776_v61, %v795_v10  ;;  %v3828_v46 = vsel %vm913_vm0, %v937_v41, %v938_v48  ;;  %v4224_v7 = vshrl.u32 %v3581_v53, 16 }
 0x176   :  { %v3816_v32 = vsel %vm913_vm0, %v928_v26, %v929_v60  ;;  %v934_v47 = vor.u32 %v929_v60, %v4222_v3  ;;  %v944_v22 = vrot.slane %v4223_v25, 1  ;;  %v911_v50 = vmul.bf16 %v3260_v27, %v3823_v18  ;;  %1852 = vmatmul.mubr.bf16.gmra.mrb[20].mxu1 %v3627_v5  ;;  %v1164_v27 = vld [vmem:[%s4180_s5] sm:$0x3] }
 0x177   :  { %v1056_v43 = vmul.bf16 %v3262_v33, %v3816_v32  ;;  %v943_v21 = vor.u32 %v938_v48, %v4224_v7  ;;  %v1059_v61 = vmul.bf16 %v3268_v9, %v3828_v46  ;;  %v4225_v38 = vshrl.u32 %v3600_v28, 16  ;;  %1903 = vmatpush1.bf16.msra.mxu1 %v2447_v30  ;;  %1729 = vmatmul.mubr.bf16.gmra.mrb[20].mxu0 %v905_v35  ;;  %v2450_v28 = vld [vmem:[%s4177_s4 + $0x2b0] ss:$8 sps:$4 sm:$0xff]   ;;  %v4239_v33 = vld [vmem:[#allocation6_spill] sm:$0xff] }
 0x178   :  { %v3840_v12 = vsel %vm913_vm0, %v934_v47, %v935_v52  ;;  %v941_v8 = vrot.slane %v761_v58, 1  ;;  %v4226_v26 = vshrl.u32 %v3605_v54, 16  ;;  %v950_v10 = vrot.slane %v785_v55, 1  ;;  %1861 = vmatprep.mubr.bf16.mxu1 %v3673_v29  ;;  %1738 = vmatprep.mubr.bf16.mxu0 %v908_v20  ;;  %v2455_v54 = vld [vmem:[%s4177_s4 + $0x2c4] ss:$8 sps:$4 sm:$0xff]   ;;  %v4227_v35 = vld [vmem:[#allocation8_spill] sm:$0xff] }
 0x179   :  { %v940_v44 = vor.u32 %v935_v52, %v4225_v38  ;;  %v1058_v53 = vmul.bf16 %v3268_v9, %v3840_v12  ;;  %v3848_v42 = vsel %vm913_vm0, %v943_v21, %v944_v22  ;;  %v947_v48 = vrot.slane %v777_v59, 1  ;;  %1904 = vmatprep.subr.bf16.mxu1 %v2452_v56  ;;  %v4232_v38 = vld [vmem:[#allocation2_spill] sm:$0xff] }
 0x17a   :  { %v949_v60 = vor.u32 %v944_v22, %v4226_v26  ;;  %v1061_v41 = vmul.bf16 %v3270_v2, %v3848_v42  ;;  %v956_v58 = vrot.slane %v801_v51, 1  ;;  %vm996_vm2 = vcmp.lt.s32.totalorder %v4227_v35, 8  ;;  %v2461_v35 = vld [vmem:[%s4177_s4 + $0x2e4] ss:$8 sps:$4 sm:$0xff]  }
 0x17b   :  { %v3871_v52 = vsel %vm913_vm0, %v940_v44, %v941_v8  ;;  %v4228_v55 = vshrl.u32 %v3627_v5, 16  ;;  %v953_v3 = vrot.slane %v793_v17, 1  ;;  %v955_v20 = vor.u32 %v950_v10, %v782_v24  ;;  %v4231_v5 = vld [vmem:[#allocation9_spill] sm:$0xff]  ;;  %1905 = vmatpush1.bf16.msra.mxu1 %v2450_v28  ;;  %v2453_v24 = vld [vmem:[%s4177_s4 + $0x2c0] ss:$8 sps:$4 sm:$0xff]  }
 0x17c   :  { %v1060_v59 = vmul.bf16 %v3270_v2, %v3871_v52  ;;  %v3878_v51 = vsel %vm913_vm0, %v949_v60, %v950_v10  ;;  %v952_v47 = vor.u32 %v947_v48, %v774_v39  ;;  %v959_v7 = vor.u32 %v956_v58, %v798_v34  ;;  %1906 = vmatprep.subr.bf16.mxu1 %v2455_v54  ;;  %v2458_v60 = vld [vmem:[%s4177_s4 + $0x2d4] ss:$8 sps:$4 sm:$0xff]   ;;  %v4233_v28 = vld [vmem:[#allocation3_spill] sm:$0xff] }
 0x17d   :  { %v946_v30 = vor.u32 %v941_v8, %v4228_v55  ;;  %v1063_v17 = vmul.bf16 %v4231_v5, %v3878_v51  ;;  %v958_v29 = vor.u32 %v953_v3, %v790_v0  ;;  %vm997_vm4 = vcmp.lt.s32.totalorder %v3535_v15, 8  ;;  %v4235_v55 = vld [vmem:[#allocation4_spill] sm:$0xff]  ;;  %v4237_v51 = vld [vmem:[#allocation5_spill] sm:$0xff]  ;;  %v2459_v15 = vld [vmem:[%s4177_s4 + $0x2e0] ss:$8 sps:$4 sm:$0xff]  }
 0x17e   :  { %v957_v21 = vsel %vm913_vm0, %v955_v20, %v956_v58  ;;  %v954_v56 = vsel %vm913_vm0, %v952_v47, %v953_v3  ;;  %v979_v0 = vsel %vm3886_vm3, %v959_v7, 0  ;;  %v907_v26 = vmul.bf16 %v3252_v6, %v3706_v1  ;;  %1862 = vmatmul.mubr.bf16.gmra.mrb[24].mxu1 %v3684_v13  ;;  %v2456_v58 = vld [vmem:[%s4177_s4 + $0x2d0] ss:$8 sps:$4 sm:$0xff]  }
 0x17f   :  { %v3893_v22 = vsel %vm913_vm0, %v946_v30, %v947_v48  ;;  %v1065_v34 = vmul.bf16 %v4232_v38, %v957_v21  ;;  %v1064_v44 = vmul.bf16 %v4232_v38, %v954_v56  ;;  %v978_v8 = vsel %vm3886_vm3, %v958_v29, 0  ;;  %1907 = vmatpush1.bf16.msra.mxu1 %v2453_v24  ;;  %1871 = vmatprep.mubr.bf16.mxu1 %v3692_v49  ;;  %v2464_v49 = vld [vmem:[%s4177_s4 + $0x2f4] ss:$8 sps:$4 sm:$0xff]  }
 0x180   :  { %v1062_v39 = vmul.bf16 %v4231_v5, %v3893_v22  ;;  %v1067_v10 = vmul.bf16 %v4233_v28, %v979_v0  ;;  %v1066_v48 = vmul.bf16 %v4233_v28, %v978_v8  ;;  %1739 = vmatmul.mubr.bf16.gmra.mrb[24].mxu0 %v907_v26  ;;  %v4234_v54 = vmov 0.0   ;;  %1908 = vmatprep.subr.bf16.mxu1 %v2458_v60  ;;  %v2462_v5 = vld [vmem:[%s4177_s4 + $0x2f0] ss:$8 sps:$4 sm:$0xff]  }
 0x181   :  { %v2047_v6 = vsel %vm996_vm2, 1.0, %v4234_v54  ;;  %v2048_v1 = vsel %vm997_vm4, 1.0, %v4234_v54  ;;  %v4236_v30 = vand.u32 7, %v4235_v55  ;;  %v4238_v20 = vand.u32 7, %v4237_v51  ;;  %1748 = vmatprep.mubr.bf16.mxu0 %v910_v36 }
 0x182   :  { %v1044_v47 = vpack.c.bf16 %v2048_v1, %v2047_v6  ;;  %v1169_v9 = vrot.slane %v1164_v27, %v4239_v33 }
 0x183   :  { %v982_v3 = vadd.s32 1, %v4236_v30  ;;  %v983_v13 = vadd.s32 1, %v4238_v20  ;;  %1909 = vmatpush1.bf16.msra.mxu1 %v2456_v58 }
 0x184   :  { %1910 = vmatprep.subr.bf16.mxu1 %v2461_v35  ;;  %v1053_v45 = vmul.bf16 %v1044_v47, %v3744_v37  ;;  %v1052_v37 = vmul.bf16 %v1044_v47, %v3722_v11 }
 0x185   :  { %vm998_vm5 = vcmp.lt.s32.totalorder %v982_v3, 8  ;;  %vm999_vm6 = vcmp.lt.s32.totalorder %v983_v13, 8 }
 0x186   :  { %1872 = vmatmul.mubr.bf16.gmra.mrb[28].mxu1 %v3738_v40  ;;  %v2049_v36 = vsel %vm998_vm5, 1.0, %v4234_v54  ;;  %v2050_v25 = vsel %vm999_vm6, 1.0, %v4234_v54  ;;  %v4240_v54 = vld [vmem:[#allocation7_spill] sm:$0xff] }
 0x187   :  { %1911 = vmatpush1.bf16.msra.mxu1 %v2459_v15  ;;  %1914 = vmatprep.mubr.bf16.mxu1 %v1053_v45  ;;  %v1045_v40 = vpack.c.bf16 %v2050_v25, %v2049_v36  ;;  %v4025_v6 = vrot.slane %v1164_v27, %v4240_v54 }
 0x188   :  { %1749 = vmatmul.mubr.bf16.gmra.mrb[28].mxu0 %v909_v16  ;;  %1912 = vmatprep.subr.bf16.mxu1 %v2464_v49 }
 0x189   :  { %1758 = vmatprep.mubr.bf16.mxu0 %v912_v62  ;;  %v1055_v22 = vmul.bf16 %v1045_v40, %v3760_v14  ;;  %v1054_v19 = vmul.bf16 %v1045_v40, %v3791_v4 }
 0x18b   :  { %1913 = vmatpush1.bf16.msra.mxu1 %v2462_v5 }
 0x18e   :  { %1915 = vmatmul.mubr.bf16.vlgmr.msra.gmra.mrb[0].mxu1 %v1052_v37 }
 0x18f   :  { %1924 = vmatprep.mubr.bf16.mxu1 %v1055_v22 }
 0x190   :  { %1759 = vmatmul.mubr.bf16.gmra.mrb[32].mxu0 %v911_v50 }
 0x196   :  { %1925 = vmatmul.mubr.bf16.gmra.mrb[4].mxu1 %v1054_v19 }
 0x197   :  { %1934 = vmatprep.mubr.bf16.mxu1 %v1057_v57 }
 0x19e   :  { %1935 = vmatmul.mubr.bf16.gmra.mrb[8].mxu1 %v1056_v43 }
 0x19f   :  { %1944 = vmatprep.mubr.bf16.mxu1 %v1059_v61 }
 0x1a6   :  { %1945 = vmatmul.mubr.bf16.gmra.mrb[12].mxu1 %v1058_v53 }
 0x1a7   :  { %1954 = vmatprep.mubr.bf16.mxu1 %v1061_v41 }
 0x1ae   :  { %1955 = vmatmul.mubr.bf16.gmra.mrb[16].mxu1 %v1060_v59 }
 0x1af   :  { %1964 = vmatprep.mubr.bf16.mxu1 %v1063_v17 }
 0x1b6   :  { %1965 = vmatmul.mubr.bf16.gmra.mrb[20].mxu1 %v1062_v39 }
 0x1b7   :  { %1974 = vmatprep.mubr.bf16.mxu1 %v1065_v34 }
 0x1be   :  { %1975 = vmatmul.mubr.bf16.gmra.mrb[24].mxu1 %v1064_v44 }
 0x1bf   :  { %1984 = vmatprep.mubr.bf16.mxu1 %v1067_v10 }
 0x1c6   :  { %1985 = vmatmul.mubr.bf16.gmra.mrb[28].mxu1 %v1066_v48 }
 0x22a   :  { %v1690_v11 = vpop.f32.mrb[4].mxu0 }
 0x22b   :  { %v1691_v14 = vadd.f32 %v1690_v11, %v1169_v9  ;;  %v1692_v31 = vpop.f32.mrb[5].mxu0 }
 0x22c   :  { %v1694_v16 = vpop.f32.mrb[6].mxu0  ;;  %v1693_v30 = vadd.f32 %v1692_v31, %v4025_v6 }
 0x22d   :  { %v1695_v63 = vadd.f32 %v1694_v16, %v1169_v9  ;;  %v1696_v62 = vpop.f32.mrb[7].mxu0 }
 0x22e   :  { %v1697_v35 = vadd.f32 %v1696_v62, %v4025_v6 }
 0x232   :  { %v1700_v2 = vpop.f32.mrb[8].mxu0 }
 0x233   :  { %v1701_v4 = vadd.f32 %v1700_v2, %v1169_v9  ;;  %v1702_v23 = vpop.f32.mrb[9].mxu0 }
 0x234   :  { %v1704_v57 = vpop.f32.mrb[10].mxu0  ;;  %v1703_v19 = vadd.f32 %v1702_v23, %v4025_v6 }
 0x235   :  { %v1705_v32 = vadd.f32 %v1704_v57, %v1169_v9  ;;  %v1706_v18 = vpop.f32.mrb[11].mxu0 }
 0x23a   :  { %v1710_v43 = vpop.f32.mrb[12].mxu0 }
 0x23b   :  { %v3988_v46 = vadd.f32 %v1710_v43, %v1169_v9  ;;  %v3990_v50 = vpop.f32.mrb[13].mxu0 }
 0x23c   :  { %v1714_v61 = vpop.f32.mrb[14].mxu0  ;;  %v1713_v2 = vadd.f32 %v3990_v50, %v4025_v6 }
 0x23d   :  { %v3992_v12 = vadd.f32 %v1714_v61, %v1169_v9  ;;  %v3994_v53 = vpop.f32.mrb[15].mxu0 }
 0x242   :  { %v1720_v42 = vpop.f32.mrb[16].mxu0 }
 0x243   :  { %v3996_v41 = vadd.f32 %v1720_v42, %v1169_v9  ;;  %v3998_v52 = vpop.f32.mrb[17].mxu0 }
 0x244   :  { %v1724_v59 = vpop.f32.mrb[18].mxu0 }
 0x245   :  { %v4000_v17 = vadd.f32 %v1724_v59, %v1169_v9  ;;  %v4002_v7 = vpop.f32.mrb[19].mxu0 }
 0x24a   :  { %v1730_v29 = vpop.f32.mrb[20].mxu0 }
 0x24b   :  { %v4004_v24 = vadd.f32 %v1730_v29, %v1169_v9  ;;  %v4006_v39 = vpop.f32.mrb[21].mxu0  ;;  %v1727_v29 = vadd.f32 %v4002_v7, %v4025_v6 }
 0x24c   :  { %v1734_v21 = vpop.f32.mrb[22].mxu0 }
 0x24d   :  { %v4008_v56 = vadd.f32 %v1734_v21, %v1169_v9  ;;  %v4010_v38 = vpop.f32.mrb[23].mxu0 }
 0x24e   :  { %v1737_v54 = vadd.f32 %v4010_v38, %v4025_v6 }
 0x253   :  { %v1740_v34 = vpop.f32.mrb[24].mxu0 }
 0x254   :  { %v4012_v44 = vadd.f32 %v1740_v34, %v1169_v9  ;;  %v4014_v0 = vpop.f32.mrb[25].mxu0 }
 0x255   :  { %v1744_v8 = vpop.f32.mrb[26].mxu0 }
 0x256   :  { %v4016_v26 = vadd.f32 %v1744_v8, %v1169_v9  ;;  %v4018_v60 = vpop.f32.mrb[27].mxu0 }
 0x25b   :  { %v1750_v28 = vpop.f32.mrb[28].mxu0 }
 0x25c   :  { %v4020_v10 = vadd.f32 %v1750_v28, %v1169_v9  ;;  %v4022_v48 = vpop.f32.mrb[29].mxu0 }
 0x25d   :  { %v1754_v58 = vpop.f32.mrb[30].mxu0 }
 0x25e   :  { %v4027_v1 = vadd.f32 %v1754_v58, %v1169_v9  ;;  %v4029_v55 = vpop.f32.mrb[31].mxu0 }
 0x261   :  { %v1916_v3 = vpop.f32.mrb[0].mxu1 }
 0x262   :  { %v2224_v51 = vadd.f32 %v1916_v3, %v1691_v14  ;;  %v1918_v13 = vpop.f32.mrb[1].mxu1  ;;  %v1707_v14 = vadd.f32 %v1706_v18, %v4025_v6 }
 0x263   :  { %v1760_v20 = vpop.f32.mrb[32].mxu0  ;;  %v2226_v15 = vadd.f32 %v1918_v13, %v1693_v30  ;;  %v1920_v45 = vpop.f32.mrb[2].mxu1 }
 0x264   :  { %v4033_v47 = vadd.f32 %v1760_v20, %v1169_v9  ;;  %v4035_v49 = vpop.f32.mrb[33].mxu0  ;;  %1995 = vst [vmem:[%s4181_s6] sm:$0xff] %v2224_v51  ;;  %v2228_v36 = vadd.f32 %v1920_v45, %v1695_v63  ;;  %v1922_v5 = vpop.f32.mrb[3].mxu1 }
 0x265   :  { %v1764_v25 = vpop.f32.mrb[34].mxu0  ;;  %1996 = vst [vmem:[%s4181_s6 + $0x8] sm:$0xff] %v2226_v15  ;;  %v2230_v37 = vadd.f32 %v1922_v5, %v1697_v35  ;;  %v1747_v35 = vadd.f32 %v4018_v60, %v4025_v6 }
 0x266   :  { %v4043_v40 = vadd.f32 %v1764_v25, %v1169_v9  ;;  %v4045_v22 = vpop.f32.mrb[35].mxu0  ;;  %1997 = vst [vmem:[%s4181_s6 + $0x10] sm:$0xff] %v2228_v36 }
 0x267   :  { %1998 = vst [vmem:[%s4181_s6 + $0x18] sm:$0xff] %v2230_v37  ;;  %v1757_v37 = vadd.f32 %v4029_v55, %v4025_v6 }
 0x269   :  { %v1926_v27 = vpop.f32.mrb[4].mxu1 }
 0x26a   :  { %v2232_v33 = vadd.f32 %v1926_v27, %v1701_v4  ;;  %v1928_v11 = vpop.f32.mrb[5].mxu1 }
 0x26b   :  { %v2234_v9 = vadd.f32 %v1928_v11, %v1703_v19  ;;  %v1930_v31 = vpop.f32.mrb[6].mxu1 }
 0x26c   :  { %1999 = vst [vmem:[%s4181_s6 + $0x20] sm:$0xff] %v2232_v33  ;;  %v2236_v16 = vadd.f32 %v1930_v31, %v1705_v32  ;;  %v1932_v63 = vpop.f32.mrb[7].mxu1  ;;  %v1717_v32 = vadd.f32 %v3994_v53, %v4025_v6 }
 0x26d   :  { %2000 = vst [vmem:[%s4181_s6 + $0x28] sm:$0xff] %v2234_v9  ;;  %v2238_v62 = vadd.f32 %v1932_v63, %v1707_v14  ;;  %v1767_v9 = vadd.f32 %v4045_v22, %v4025_v6 }
 0x26e   :  { %2001 = vst [vmem:[%s4181_s6 + $0x30] sm:$0xff] %v2236_v16 }
 0x26f   :  { %2002 = vst [vmem:[%s4181_s6 + $0x38] sm:$0xff] %v2238_v62 }
 0x271   :  { %v1936_v4 = vpop.f32.mrb[8].mxu1 }
 0x272   :  { %v2240_v23 = vadd.f32 %v1936_v4, %v3988_v46  ;;  %v1938_v57 = vpop.f32.mrb[9].mxu1  ;;  %v1723_v46 = vadd.f32 %v3998_v52, %v4025_v6 }
 0x273   :  { %v2242_v18 = vadd.f32 %v1938_v57, %v1713_v2  ;;  %v1940_v43 = vpop.f32.mrb[10].mxu1 }
 0x274   :  { %2003 = vst [vmem:[%s4181_s6 + $0x40] sm:$0xff] %v2240_v23  ;;  %v2244_v61 = vadd.f32 %v1940_v43, %v3992_v12  ;;  %v1942_v42 = vpop.f32.mrb[11].mxu1 }
 0x275   :  { %2004 = vst [vmem:[%s4181_s6 + $0x48] sm:$0xff] %v2242_v18  ;;  %v2246_v50 = vadd.f32 %v1942_v42, %v1717_v32 }
 0x276   :  { %2005 = vst [vmem:[%s4181_s6 + $0x50] sm:$0xff] %v2244_v61 }
 0x277   :  { %2006 = vst [vmem:[%s4181_s6 + $0x58] sm:$0xff] %v2246_v50 }
 0x279   :  { %v1946_v53 = vpop.f32.mrb[12].mxu1 }
 0x27a   :  { %v2248_v12 = vadd.f32 %v1946_v53, %v3996_v41  ;;  %v1948_v59 = vpop.f32.mrb[13].mxu1  ;;  %v1733_v41 = vadd.f32 %v4006_v39, %v4025_v6 }
 0x27b   :  { %v2250_v21 = vadd.f32 %v1948_v59, %v1723_v46  ;;  %v1950_v34 = vpop.f32.mrb[14].mxu1 }
 0x27c   :  { %2007 = vst [vmem:[%s4181_s6 + $0x60] sm:$0xff] %v2248_v12  ;;  %v2252_v8 = vadd.f32 %v1950_v34, %v4000_v17  ;;  %v1952_v28 = vpop.f32.mrb[15].mxu1 }
 0x27d   :  { %2008 = vst [vmem:[%s4181_s6 + $0x68] sm:$0xff] %v2250_v21  ;;  %v2254_v52 = vadd.f32 %v1952_v28, %v1727_v29 }
 0x27e   :  { %2009 = vst [vmem:[%s4181_s6 + $0x70] sm:$0xff] %v2252_v8 }
 0x27f   :  { %2010 = vst [vmem:[%s4181_s6 + $0x78] sm:$0xff] %v2254_v52 }
 0x281   :  { %v1956_v7 = vpop.f32.mrb[16].mxu1 }
 0x282   :  { %v2256_v17 = vadd.f32 %v1956_v7, %v4004_v24  ;;  %v1958_v58 = vpop.f32.mrb[17].mxu1  ;;  %v1743_v24 = vadd.f32 %v4014_v0, %v4025_v6 }
 0x283   :  { %v2258_v30 = vadd.f32 %v1958_v58, %v1733_v41  ;;  %v1960_v3 = vpop.f32.mrb[18].mxu1 }
 0x284   :  { %2011 = vst [vmem:[%s4181_s6 + $0x80] sm:$0xff] %v2256_v17  ;;  %v2260_v51 = vadd.f32 %v1960_v3, %v4008_v56  ;;  %v1962_v20 = vpop.f32.mrb[19].mxu1 }
 0x285   :  { %2012 = vst [vmem:[%s4181_s6 + $0x88] sm:$0xff] %v2258_v30  ;;  %v2262_v39 = vadd.f32 %v1962_v20, %v1737_v54 }
 0x286   :  { %2013 = vst [vmem:[%s4181_s6 + $0x90] sm:$0xff] %v2260_v51 }
 0x287   :  { %2014 = vst [vmem:[%s4181_s6 + $0x98] sm:$0xff] %v2262_v39 }
 0x289   :  { %v1966_v38 = vpop.f32.mrb[20].mxu1 }
 0x28a   :  { %v2264_v56 = vadd.f32 %v1966_v38, %v4012_v44  ;;  %v1968_v13 = vpop.f32.mrb[21].mxu1  ;;  %v1753_v44 = vadd.f32 %v4022_v48, %v4025_v6 }
 0x28b   :  { %v2266_v15 = vadd.f32 %v1968_v13, %v1743_v24  ;;  %v1970_v45 = vpop.f32.mrb[22].mxu1 }
 0x28c   :  { %2015 = vst [vmem:[%s4181_s6 + $0xa0] sm:$0xff] %v2264_v56  ;;  %v2268_v36 = vadd.f32 %v1970_v45, %v4016_v26  ;;  %v1972_v25 = vpop.f32.mrb[23].mxu1 }
 0x28d   :  { %2016 = vst [vmem:[%s4181_s6 + $0xa8] sm:$0xff] %v2266_v15  ;;  %v2270_v0 = vadd.f32 %v1972_v25, %v1747_v35 }
 0x28e   :  { %2017 = vst [vmem:[%s4181_s6 + $0xb0] sm:$0xff] %v2268_v36 }
 0x28f   :  { %2018 = vst [vmem:[%s4181_s6 + $0xb8] sm:$0xff] %v2270_v0 }
 0x291   :  { %v1976_v60 = vpop.f32.mrb[24].mxu1 }
 0x292   :  { %v2272_v26 = vadd.f32 %v1976_v60, %v4020_v10  ;;  %v1978_v5 = vpop.f32.mrb[25].mxu1  ;;  %v1763_v10 = vadd.f32 %v4035_v49, %v4025_v6 }
 0x293   :  { %v2274_v19 = vadd.f32 %v1978_v5, %v1753_v44  ;;  %v1980_v27 = vpop.f32.mrb[26].mxu1 }
 0x294   :  { %2019 = vst [vmem:[%s4181_s6 + $0xc0] sm:$0xff] %v2272_v26  ;;  %v2276_v33 = vadd.f32 %v1980_v27, %v4027_v1  ;;  %v1982_v11 = vpop.f32.mrb[27].mxu1 }
 0x295   :  { %2020 = vst [vmem:[%s4181_s6 + $0xc8] sm:$0xff] %v2274_v19  ;;  %v2278_v48 = vadd.f32 %v1982_v11, %v1757_v37 }
 0x296   :  { %2021 = vst [vmem:[%s4181_s6 + $0xd0] sm:$0xff] %v2276_v33 }
 0x297   :  { %2022 = vst [vmem:[%s4181_s6 + $0xd8] sm:$0xff] %v2278_v48 }
 0x299   :  { %v1986_v55 = vpop.f32.mrb[28].mxu1 }
 0x29a   :  { %v2280_v1 = vadd.f32 %v1986_v55, %v4033_v47  ;;  %v1988_v14 = vpop.f32.mrb[29].mxu1 }
 0x29b   :  { %v2282_v31 = vadd.f32 %v1988_v14, %v1763_v10  ;;  %v1990_v16 = vpop.f32.mrb[30].mxu1 }
 0x29c   :  { %2023 = vst [vmem:[%s4181_s6 + $0xe0] sm:$0xff] %v2280_v1  ;;  %v2284_v63 = vadd.f32 %v1990_v16, %v4043_v40  ;;  %v1992_v62 = vpop.f32.mrb[31].mxu1 }
 0x29d   :  { %2024 = vst [vmem:[%s4181_s6 + $0xe8] sm:$0xff] %v2282_v31  ;;  %v2286_v49 = vadd.f32 %v1992_v62, %v1767_v9 }
 0x29e   :  { %2025 = vst [vmem:[%s4181_s6 + $0xf0] sm:$0xff] %v2284_v63 }
 0x29f   :  { %2026 = vst [vmem:[%s4181_s6 + $0xf8] sm:$0xff] %v2286_v49 }

// kernel: decoupled_forward.3
= control target key start
LH: loop header
LB: loop body
LE: loop exit
PB: predicated region body
PF: predicated region fallthrough
CT: control target
= control target key end

     0   :  { %vm171_vm0 = vcmask 1040384   ;;  %s1751_s3 = inlined_call_operand.vmem [shape: f32[256,256], index: 3, kind: input, shape index: {}]   ;;  %s1752_s0 = inlined_call_operand.vmem [shape: f32[128,256], index: 0, kind: input, shape index: {}]   ;;  %s1753_s4 = inlined_call_operand.vmem [shape: bf16[256,256], index: 4, kind: input, shape index: {}]   ;;  %s1754_s1 = inlined_call_operand.vmem [shape: f32[1,256], index: 1, kind: input, shape index: {}]   ;;  %s1755_s2 = inlined_call_operand.vmem [shape: f32[1,256], index: 2, kind: input, shape index: {}]   ;;  %s1756_s5 = inlined_call_operand.vmem [shape: f32[1,256], index: 5, kind: input, shape index: {}]   ;;  %s1757_s6 = inlined_call_operand.vmem [shape: f32[128,256], index: 6, kind: output, shape index: {}]  }
   0x1   :  { %v175_v0 = vld [vmem:[%s1751_s3 + $0x8] sm:$0xff]  ;;  %v177_v1 = vld [vmem:[%s1751_s3 + $0x18] sm:$0xff]  ;;  %v174_v2 = vld [vmem:[%s1751_s3] sm:$0xff] }
   0x2   :  { %v853_v3 = vpack.c.bf16 %v177_v1, %v175_v0  ;;  %v176_v4 = vld [vmem:[%s1751_s3 + $0x10] sm:$0xff]  ;;  %v179_v5 = vld [vmem:[%s1751_s3 + $0x28] sm:$0xff]  ;;  %v181_v6 = vld [vmem:[%s1751_s3 + $0x38] sm:$0xff] }
   0x3   :  { %v855_v7 = vpack.c.bf16 %v176_v4, %v174_v2  ;;  %v857_v8 = vpack.c.bf16 %v181_v6, %v179_v5  ;;  %v178_v9 = vld [vmem:[%s1751_s3 + $0x20] sm:$0xff]  ;;  %v180_v10 = vld [vmem:[%s1751_s3 + $0x30] sm:$0xff]  ;;  %v183_v11 = vld [vmem:[%s1751_s3 + $0x48] sm:$0xff] }
   0x4   :  { %854 = vmatprep.subr.bf16.mxu0 %v853_v3  ;;  %v185_v12 = vld [vmem:[%s1751_s3 + $0x58] sm:$0xff]  ;;  %v859_v13 = vpack.c.bf16 %v180_v10, %v178_v9  ;;  %v182_v15 = vld [vmem:[%s1751_s3 + $0x40] sm:$0xff]  ;;  %v184_v16 = vld [vmem:[%s1751_s3 + $0x50] sm:$0xff] }
   0x5   :  { %856 = vmatpush1.bf16.msra.mxu0 %v855_v7  ;;  %v861_v14 = vpack.c.bf16 %v185_v12, %v183_v11  ;;  %v187_v17 = vld [vmem:[%s1751_s3 + $0x68] sm:$0xff]  ;;  %v189_v18 = vld [vmem:[%s1751_s3 + $0x78] sm:$0xff]  ;;  %v863_v19 = vpack.c.bf16 %v184_v16, %v182_v15  ;;  %v186_v21 = vld [vmem:[%s1751_s3 + $0x60] sm:$0xff] }
   0x6   :  { %858 = vmatprep.subr.bf16.mxu0 %v857_v8  ;;  %v865_v20 = vpack.c.bf16 %v189_v18, %v187_v17  ;;  %v188_v22 = vld [vmem:[%s1751_s3 + $0x70] sm:$0xff]  ;;  %v191_v23 = vld [vmem:[%s1751_s3 + $0x88] sm:$0xff]  ;;  %v193_v24 = vld [vmem:[%s1751_s3 + $0x98] sm:$0xff] }
   0x7   :  { %v867_v25 = vpack.c.bf16 %v188_v22, %v186_v21  ;;  %v869_v26 = vpack.c.bf16 %v193_v24, %v191_v23  ;;  %v190_v27 = vld [vmem:[%s1751_s3 + $0x80] sm:$0xff]  ;;  %v192_v28 = vld [vmem:[%s1751_s3 + $0x90] sm:$0xff]  ;;  %v195_v29 = vld [vmem:[%s1751_s3 + $0xa8] sm:$0xff] }
   0x8   :  { %v197_v30 = vld [vmem:[%s1751_s3 + $0xb8] sm:$0xff]  ;;  %v871_v31 = vpack.c.bf16 %v192_v28, %v190_v27  ;;  %v194_v33 = vld [vmem:[%s1751_s3 + $0xa0] sm:$0xff]  ;;  %v196_v34 = vld [vmem:[%s1751_s3 + $0xb0] sm:$0xff] }
   0x9   :  { %860 = vmatpush1.bf16.msra.mxu0 %v859_v13  ;;  %v873_v32 = vpack.c.bf16 %v197_v30, %v195_v29  ;;  %v199_v35 = vld [vmem:[%s1751_s3 + $0xc8] sm:$0xff]  ;;  %v201_v36 = vld [vmem:[%s1751_s3 + $0xd8] sm:$0xff]  ;;  %v875_v37 = vpack.c.bf16 %v196_v34, %v194_v33  ;;  %v198_v38 = vld [vmem:[%s1751_s3 + $0xc0] sm:$0xff] }
   0xa   :  { %862 = vmatprep.subr.bf16.mxu0 %v861_v14  ;;  %v200_v39 = vld [vmem:[%s1751_s3 + $0xd0] sm:$0xff]  ;;  %v877_v40 = vpack.c.bf16 %v201_v36, %v199_v35  ;;  %v203_v41 = vld [vmem:[%s1751_s3 + $0xe8] sm:$0xff]  ;;  %v1101_v43 = vld [vmem:[%s1752_s0 + $0x18] sm:$0xff] }
   0xb   :  { %v1096_v42 = vld [vmem:[%s1752_s0 + $0x8] sm:$0xff]  ;;  %v205_v44 = vld [vmem:[%s1751_s3 + $0xf8] sm:$0xff]  ;;  %v100_v49 = vmul.f32 %v1101_v43, %v1101_v43  ;;  %v879_v51 = vpack.c.bf16 %v200_v39, %v198_v38  ;;  %v202_v55 = vld [vmem:[%s1751_s3 + $0xe0] sm:$0xff] }
   0xc   :  { %v1109_v45 = vld [vmem:[%s1752_s0 + $0x28] sm:$0xff]  ;;  %v1114_v46 = vld [vmem:[%s1752_s0 + $0x38] sm:$0xff]  ;;  %v76_v47 = vadd.f32 %v1101_v43, %v1096_v42  ;;  %v98_v48 = vmul.f32 %v1096_v42, %v1096_v42  ;;  %v881_v54 = vpack.c.bf16 %v205_v44, %v203_v41  ;;  %v204_v56 = vld [vmem:[%s1751_s3 + $0xf0] sm:$0xff] }
   0xd   :  { %864 = vmatpush1.bf16.msra.mxu0 %v863_v19  ;;  %v102_v50 = vmul.f32 %v1109_v45, %v1109_v45  ;;  %v1127_v52 = vld [vmem:[%s1752_s0 + $0x48] sm:$0xff]  ;;  %v104_v57 = vmul.f32 %v1114_v46, %v1114_v46  ;;  %v209_v60 = vld [vmem:[%s1751_s3 + $0x118] sm:$0xff]  ;;  %v1155_v1 = vld [vmem:[%s1752_s0] sm:$0xff]  ;;  %v883_v3 = vpack.c.bf16 %v204_v56, %v202_v55 }
   0xe   :  { %866 = vmatprep.subr.bf16.mxu0 %v865_v20  ;;  %v77_v53 = vadd.f32 %v76_v47, %v1109_v45  ;;  %v150_v58 = vadd.f32 %v100_v49, %v98_v48  ;;  %v207_v59 = vld [vmem:[%s1751_s3 + $0x108] sm:$0xff]  ;;  %v1147_v61 = vld [vmem:[%s1752_s0 + $0x58] sm:$0xff]  ;;  %v106_v63 = vmul.f32 %v1127_v52, %v1127_v52  ;;  %v1160_v2 = vld [vmem:[%s1752_s0 + $0x10] sm:$0xff]  ;;  %v97_v20 = vmul.f32 %v1155_v1, %v1155_v1 }
   0xf   :  { %v206_v4 = vld [vmem:[%s1751_s3 + $0x100] sm:$0xff]  ;;  %v208_v5 = vld [vmem:[%s1751_s3 + $0x110] sm:$0xff]  ;;  %v1171_v6 = vld [vmem:[%s1752_s0 + $0x68] sm:$0xff]  ;;  %v55_v8 = vadd.f32 %v1160_v2, %v1155_v1  ;;  %v885_v9 = vpack.c.bf16 %v209_v60, %v207_v59  ;;  %v108_v12 = vmul.f32 %v1147_v61, %v1147_v61  ;;  %v99_v21 = vmul.f32 %v1160_v2, %v1160_v2 }
  0x10   :  { %v78_v62 = vadd.f32 %v77_v53, %v1114_v46  ;;  %v151_v0 = vadd.f32 %v150_v58, %v102_v50  ;;  %v211_v10 = vld [vmem:[%s1751_s3 + $0x128] sm:$0xff]  ;;  %v213_v11 = vld [vmem:[%s1751_s3 + $0x138] sm:$0xff]  ;;  %v1187_v14 = vld [vmem:[%s1752_s0 + $0x20] sm:$0xff]  ;;  %v110_v23 = vmul.f32 %v1171_v6, %v1171_v6  ;;  %v887_v27 = vpack.c.bf16 %v208_v5, %v206_v4 }
  0x11   :  { %868 = vmatpush1.bf16.msra.mxu0 %v867_v25  ;;  %v1192_v15 = vld [vmem:[%s1751_s3 + $0x120] sm:$0xff]  ;;  %v1197_v16 = vld [vmem:[%s1751_s3 + $0x130] sm:$0xff]  ;;  %v1202_v17 = vld [vmem:[%s1752_s0 + $0x78] sm:$0xff]  ;;  %v56_v19 = vadd.f32 %v55_v8, %v1187_v14  ;;  %v101_v33 = vmul.f32 %v1187_v14, %v1187_v14  ;;  %v889_v35 = vpack.c.bf16 %v213_v11, %v211_v10  ;;  %v129_v50 = vadd.f32 %v99_v21, %v97_v20 }
  0x12   :  { %870 = vmatprep.subr.bf16.mxu0 %v869_v26  ;;  %v79_v7 = vadd.f32 %v78_v62, %v1127_v52  ;;  %v152_v13 = vadd.f32 %v151_v0, %v104_v57  ;;  %v1213_v22 = vld [vmem:[%s1752_s0 + $0x88] sm:$0xff]  ;;  %v1220_v25 = vld [vmem:[%s1752_s0 + $0x30] sm:$0xff]  ;;  %v1225_v26 = vld [vmem:[%s1752_s0 + $0x40] sm:$0xff]  ;;  %v112_v36 = vmul.f32 %v1202_v17, %v1202_v17  ;;  %v891_v53 = vpack.c.bf16 %v1197_v16, %v1192_v15 }
  0x13   :  { %v1230_v28 = vld [vmem:[%s1751_s3 + $0x148] sm:$0xff]  ;;  %v1235_v29 = vld [vmem:[%s1751_s3 + $0x158] sm:$0xff]  ;;  %v1257_v39 = vld [vmem:[%s1751_s3 + $0x140] sm:$0xff]  ;;  %v103_v49 = vmul.f32 %v1220_v25, %v1220_v25  ;;  %v105_v57 = vmul.f32 %v1225_v26, %v1225_v26 }
  0x14   :  { %v80_v18 = vadd.f32 %v79_v7, %v1147_v61  ;;  %v153_v24 = vadd.f32 %v152_v13, %v106_v63  ;;  %v1240_v30 = vld [vmem:[%s1752_s0 + $0x98] sm:$0xff]  ;;  %v918_v34 = vld [vmem:[%s1753_s4 + $0x4] ss:$8 sps:$4 sm:$0xff]   ;;  %v920_v38 = vld [vmem:[%s1753_s4] ss:$8 sps:$4 sm:$0xff]   ;;  %v893_v5 = vpack.c.bf16 %v1235_v29, %v1230_v28 }
  0x15   :  { %872 = vmatpush1.bf16.msra.mxu0 %v871_v31  ;;  %v1267_v41 = vld [vmem:[%s1752_s0 + $0xa8] sm:$0xff]  ;;  %v1273_v47 = vld [vmem:[%s1752_s0 + $0x50] sm:$0xff]  ;;  %672 = vmatprep.subr.bf16.mxu1 %v918_v34  ;;  %v1288_v56 = vld [vmem:[%s1752_s0 + $0x60] sm:$0xff]  ;;  %v116_v7 = vmul.f32 %v1240_v30, %v1240_v30 }
  0x16   :  { %874 = vmatprep.subr.bf16.mxu0 %v873_v32  ;;  %v81_v31 = vadd.f32 %v80_v18, %v1171_v6  ;;  %v57_v32 = vadd.f32 %v56_v19, %v1220_v25  ;;  %673 = vmatpush1.bf16.msra.mxu1 %v920_v38  ;;  %v923_v58 = vld [vmem:[%s1753_s4 + $0x10] ss:$8 sps:$4 sm:$0xff]   ;;  %v219_v59 = vld [vmem:[%s1751_s3 + $0x168] sm:$0xff]  ;;  %v218_v11 = vld [vmem:[%s1751_s3 + $0x160] sm:$0xff]  ;;  %v107_v19 = vmul.f32 %v1273_v47, %v1273_v47 }
  0x17   :  { %v221_v60 = vld [vmem:[%s1751_s3 + $0x178] sm:$0xff]  ;;  %v924_v4 = vld [vmem:[%s1753_s4 + $0x24] ss:$8 sps:$4 sm:$0xff]   ;;  %v926_v10 = vld [vmem:[%s1753_s4 + $0x20] ss:$8 sps:$4 sm:$0xff]   ;;  %v109_v28 = vmul.f32 %v1288_v56, %v1288_v56 }
  0x18   :  { %v82_v44 = vadd.f32 %v81_v31, %v1202_v17  ;;  %v58_v48 = vadd.f32 %v57_v32, %v1225_v26  ;;  %v1304_v62 = vld [vmem:[%s1752_s0 + $0xb8] sm:$0xff]  ;;  %v1332_v13 = vld [vmem:[%s1752_s0 + $0xc8] sm:$0xff]  ;;  %v1338_v16 = vld [vmem:[%s1752_s0 + $0x80] sm:$0xff] }
  0x19   :  { %876 = vmatpush1.bf16.msra.mxu0 %v875_v37  ;;  %v154_v37 = vadd.f32 %v153_v24, %v108_v12  ;;  %v220_v12 = vld [vmem:[%s1751_s3 + $0x170] sm:$0xff]  ;;  %v118_v24 = vmul.f32 %v1267_v41, %v1267_v41  ;;  %v223_v29 = vld [vmem:[%s1751_s3 + $0x188] sm:$0xff]  ;;  %v225_v31 = vld [vmem:[%s1751_s3 + $0x198] sm:$0xff] }
  0x1a   :  { %878 = vmatprep.subr.bf16.mxu0 %v877_v40  ;;  %v1262_v40 = vld [vmem:[%s1751_s3 + $0x150] sm:$0xff]  ;;  %v83_v63 = vadd.f32 %v82_v44, %v1213_v22  ;;  %v59_v0 = vadd.f32 %v58_v48, %v1273_v47  ;;  %v1361_v32 = vld [vmem:[%s1752_s0 + $0xd8] sm:$0xff]  ;;  %v222_v44 = vld [vmem:[%s1751_s3 + $0x180] sm:$0xff] }
  0x1b   :  { %v155_v55 = vadd.f32 %v154_v37, %v110_v23  ;;  %v927_v21 = vld [vmem:[%s1753_s4 + $0x34] ss:$8 sps:$4 sm:$0xff]   ;;  %v895_v23 = vpack.c.bf16 %v1262_v40, %v1257_v39  ;;  %v120_v37 = vmul.f32 %v1304_v62, %v1304_v62  ;;  %v929_v40 = vld [vmem:[%s1753_s4 + $0x30] ss:$8 sps:$4 sm:$0xff]  }
  0x1c   :  { %v84_v15 = vadd.f32 %v83_v63, %v1240_v30  ;;  %v60_v18 = vadd.f32 %v59_v0, %v1288_v56  ;;  %v1370_v39 = vld [vmem:[%s1752_s0 + $0x90] sm:$0xff] }
  0x1d   :  { %880 = vmatpush1.bf16.msra.mxu0 %v879_v51  ;;  %v921_v51 = vld [vmem:[%s1753_s4 + $0x14] ss:$8 sps:$4 sm:$0xff]   ;;  %v156_v8 = vadd.f32 %v155_v55, %v112_v36  ;;  %v897_v36 = vpack.c.bf16 %v221_v60, %v219_v59  ;;  %v899_v55 = vpack.c.bf16 %v220_v12, %v218_v11  ;;  %v113_v59 = vmul.f32 %v1338_v16, %v1338_v16 }
  0x1e   :  { %882 = vmatprep.subr.bf16.mxu0 %v881_v54  ;;  %v114_v54 = vmul.f32 %v1213_v22, %v1213_v22  ;;  %674 = vmatprep.subr.bf16.mxu1 %v921_v51  ;;  %v224_v48 = vld [vmem:[%s1751_s3 + $0x190] sm:$0xff]  ;;  %v1412_v11 = vld [vmem:[%s1752_s0 + $0xf8] sm:$0xff] }
  0x1f   :  { %675 = vmatpush1.bf16.msra.mxu1 %v923_v58 }
  0x20   :  { %676 = vmatprep.subr.bf16.mxu1 %v924_v4  ;;  %v124_v4 = vmul.f32 %v1361_v32, %v1361_v32 }
  0x21   :  { %884 = vmatpush1.bf16.msra.mxu0 %v883_v3  ;;  %v130_v3 = vadd.f32 %v129_v50, %v101_v33  ;;  %v85_v33 = vadd.f32 %v84_v15, %v1267_v41 }
  0x22   :  { %886 = vmatprep.subr.bf16.mxu0 %v885_v9  ;;  %v1318_v9 = vld [vmem:[%s1752_s0 + $0x70] sm:$0xff] }
  0x23   :  { %v131_v20 = vadd.f32 %v130_v3, %v103_v49  ;;  %v61_v34 = vadd.f32 %v60_v18, %v1318_v9  ;;  %v1384_v49 = vld [vmem:[%s1752_s0 + $0xe8] sm:$0xff]  ;;  %v86_v50 = vadd.f32 %v85_v33, %v1304_v62  ;;  %677 = vmatpush1.bf16.msra.mxu1 %v926_v10  ;;  %v901_v3 = vpack.c.bf16 %v225_v31, %v223_v29  ;;  %v229_v10 = vld [vmem:[%s1751_s3 + $0x1b8] sm:$0xff] }
  0x24   :  { %678 = vmatprep.subr.bf16.mxu1 %v927_v21  ;;  %v115_v18 = vmul.f32 %v1370_v39, %v1370_v39  ;;  %v126_v21 = vmul.f32 %v1384_v49, %v1384_v49 }
  0x25   :  { %888 = vmatpush1.bf16.msra.mxu0 %v887_v27  ;;  %v157_v27 = vadd.f32 %v156_v8, %v114_v54  ;;  %v62_v51 = vadd.f32 %v61_v34, %v1338_v16  ;;  %v87_v60 = vadd.f32 %v86_v50, %v1332_v13  ;;  %v227_v8 = vld [vmem:[%s1751_s3 + $0x1a8] sm:$0xff] }
  0x26   :  { %890 = vmatprep.subr.bf16.mxu0 %v889_v35  ;;  %v132_v35 = vadd.f32 %v131_v20, %v105_v57  ;;  %v122_v57 = vmul.f32 %v1332_v13, %v1332_v13  ;;  %v903_v20 = vpack.c.bf16 %v224_v48, %v222_v44  ;;  %v233_v44 = vld [vmem:[%s1751_s3 + $0x1d8] sm:$0xff] }
  0x27   :  { %v158_v38 = vadd.f32 %v157_v27, %v116_v7  ;;  %v63_v63 = vadd.f32 %v62_v51, %v1370_v39  ;;  %v1401_v7 = vld [vmem:[%s1752_s0 + $0xa0] sm:$0xff]  ;;  %v88_v12 = vadd.f32 %v87_v60, %v1361_v32  ;;  %679 = vmatpush1.bf16.msra.mxu1 %v929_v40  ;;  %v231_v40 = vld [vmem:[%s1751_s3 + $0x1c8] sm:$0xff] }
  0x28   :  { %v133_v54 = vadd.f32 %v132_v35, %v107_v19  ;;  %v226_v27 = vld [vmem:[%s1751_s3 + $0x1a0] sm:$0xff]  ;;  %v117_v33 = vmul.f32 %v1401_v7, %v1401_v7  ;;  %v905_v35 = vpack.c.bf16 %v229_v10, %v227_v8  ;;  %v235_v10 = vld [vmem:[%s1751_s3 + $0x1e8] sm:$0xff] }
  0x29   :  { %892 = vmatpush1.bf16.msra.mxu0 %v891_v53  ;;  %v111_v53 = vmul.f32 %v1318_v9, %v1318_v9  ;;  %v159_v58 = vadd.f32 %v158_v38, %v118_v24  ;;  %v64_v15 = vadd.f32 %v63_v63, %v1401_v7  ;;  %v1423_v24 = vld [vmem:[%s1752_s0 + $0xb0] sm:$0xff]  ;;  %v89_v29 = vadd.f32 %v88_v12, %v1384_v49  ;;  %v1440_v38 = vld [vmem:[%s1752_s0 + $0xc0] sm:$0xff]  ;;  %v237_v12 = vld [vmem:[%s1751_s3 + $0x1f8] sm:$0xff] }
  0x2a   :  { %894 = vmatprep.subr.bf16.mxu0 %v893_v5  ;;  %v134_v0 = vadd.f32 %v133_v54, %v109_v28  ;;  %v228_v28 = vld [vmem:[%s1751_s3 + $0x1b0] sm:$0xff]  ;;  %v119_v51 = vmul.f32 %v1423_v24, %v1423_v24  ;;  %v1469_v8 = vld [vmem:[%s1752_s0 + $0xe0] sm:$0xff] }
  0x2b   :  { %v160_v5 = vadd.f32 %v159_v58, %v120_v37  ;;  %v65_v31 = vadd.f32 %v64_v15, %v1423_v24  ;;  %v90_v48 = vadd.f32 %v89_v29, %v1412_v11  ;;  %v907_v54 = vpack.c.bf16 %v228_v28, %v226_v27  ;;  %v230_v58 = vld [vmem:[%s1751_s3 + $0x1c0] sm:$0xff]  ;;  %v1483_v27 = vld [vmem:[%s1752_s0 + $0xf0] sm:$0xff] }
  0x2c   :  { %v135_v19 = vadd.f32 %v134_v0, %v111_v53  ;;  %v121_v0 = vmul.f32 %v1440_v38, %v1440_v38 }
  0x2d   :  { %896 = vmatpush1.bf16.msra.mxu0 %v895_v23  ;;  %v161_v23 = vadd.f32 %v160_v5, %v122_v57  ;;  %v66_v50 = vadd.f32 %v65_v31, %v1440_v38  ;;  %v1455_v57 = vld [vmem:[%s1752_s0 + $0xd0] sm:$0xff]  ;;  %v91_v60 = vrot.slane %v90_v48, 4  ;;  %v125_v31 = vmul.f32 %v1469_v8, %v1469_v8 }
  0x2e   :  { %898 = vmatprep.subr.bf16.mxu0 %v897_v36  ;;  %v136_v34 = vadd.f32 %v135_v19, %v113_v59  ;;  %v128_v36 = vmul.f32 %v1412_v11, %v1412_v11  ;;  %v232_v59 = vld [vmem:[%s1751_s3 + $0x1d0] sm:$0xff]  ;;  %v123_v19 = vmul.f32 %v1455_v57, %v1455_v57 }
  0x2f   :  { %v162_v37 = vadd.f32 %v161_v23, %v124_v4  ;;  %v67_v63 = vadd.f32 %v66_v50, %v1455_v57  ;;  %v909_v4 = vpack.c.bf16 %v233_v44, %v231_v40  ;;  %v92_v15 = vadd.f32 %v91_v60, %v90_v48 }
  0x30   :  { %v137_v53 = vadd.f32 %v136_v34, %v115_v18  ;;  %v913_v34 = vpack.c.bf16 %v237_v12, %v235_v10  ;;  %v127_v48 = vmul.f32 %v1483_v27, %v1483_v27 }
  0x31   :  { %900 = vmatpush1.bf16.msra.mxu0 %v899_v55  ;;  %v163_v55 = vadd.f32 %v162_v37, %v126_v21  ;;  %v68_v18 = vadd.f32 %v67_v63, %v1469_v8  ;;  %v911_v21 = vpack.c.bf16 %v232_v59, %v230_v58  ;;  %v93_v28 = vrot.slane %v92_v15, 2 }
  0x32   :  { %902 = vmatprep.subr.bf16.mxu0 %v901_v3  ;;  %v138_v3 = vadd.f32 %v137_v53, %v117_v33 }
  0x33   :  { %v164_v5 = vadd.f32 %v163_v55, %v128_v36  ;;  %v69_v29 = vadd.f32 %v68_v18, %v1483_v27  ;;  %v236_v36 = vld [vmem:[%s1751_s3 + $0x1f0] sm:$0xff]  ;;  %v94_v40 = vadd.f32 %v93_v28, %v92_v15 }
  0x35   :  { %904 = vmatpush1.bf16.msra.mxu0 %v903_v20  ;;  %v139_v20 = vadd.f32 %v138_v3, %v119_v51  ;;  %v165_v23 = vrot.slane %v164_v5, 4  ;;  %v70_v44 = vrot.slane %v69_v29, 4 }
  0x36   :  { %906 = vmatprep.subr.bf16.mxu0 %v905_v35  ;;  %v234_v35 = vld [vmem:[%s1751_s3 + $0x1e0] sm:$0xff] }
  0x37   :  { %v140_v33 = vadd.f32 %v139_v20, %v121_v0  ;;  %v166_v37 = vadd.f32 %v165_v23, %v164_v5  ;;  %v915_v53 = vpack.c.bf16 %v236_v36, %v234_v35  ;;  %v71_v55 = vadd.f32 %v70_v44, %v69_v29  ;;  %v935_v35 = vld [vmem:[%s1753_s4 + $0x50] ss:$8 sps:$4 sm:$0xff]   ;;  %v936_v36 = vld [vmem:[%s1753_s4 + $0x64] ss:$8 sps:$4 sm:$0xff]  }
  0x38   :  { %v941_v44 = vld [vmem:[%s1753_s4 + $0x70] ss:$8 sps:$4 sm:$0xff]  }
  0x39   :  { %908 = vmatpush1.bf16.msra.mxu0 %v907_v54  ;;  %v141_v50 = vadd.f32 %v140_v33, %v123_v19  ;;  %v167_v51 = vrot.slane %v166_v37, 2  ;;  %v95_v54 = vrot.slane %v94_v40, 1  ;;  %v72_v60 = vrot.slane %v71_v55, 2  ;;  %v932_v33 = vld [vmem:[%s1753_s4 + $0x40] ss:$8 sps:$4 sm:$0xff]  }
  0x3a   :  { %910 = vmatprep.subr.bf16.mxu0 %v909_v4 }
  0x3b   :  { %v142_v58 = vadd.f32 %v141_v50, %v125_v31  ;;  %v168_v59 = vadd.f32 %v167_v51, %v166_v37  ;;  %v96_v0 = vadd.f32 %v95_v54, %v94_v40  ;;  %v73_v4 = vadd.f32 %v72_v60, %v71_v55  ;;  %v930_v31 = vld [vmem:[%s1753_s4 + $0x44] ss:$8 sps:$4 sm:$0xff]   ;;  %v938_v37 = vld [vmem:[%s1753_s4 + $0x60] ss:$8 sps:$4 sm:$0xff]   ;;  %v939_v40 = vld [vmem:[%s1753_s4 + $0x74] ss:$8 sps:$4 sm:$0xff]  }
  0x3c   :  { %680 = vmatprep.subr.bf16.mxu1 %v930_v31  ;;  %v944_v50 = vld [vmem:[%s1753_s4 + $0x80] ss:$8 sps:$4 sm:$0xff]   ;;  %v945_v51 = vld [vmem:[%s1753_s4 + $0x94] ss:$8 sps:$4 sm:$0xff]   ;;  %v948_v54 = vld [vmem:[%s1753_s4 + $0xa4] ss:$8 sps:$4 sm:$0xff]  }
  0x3d   :  { %912 = vmatpush1.bf16.msra.mxu0 %v911_v21  ;;  %v143_v63 = vadd.f32 %v142_v58, %v127_v48  ;;  %v169_v3 = vrot.slane %v168_v59, 1  ;;  %v74_v18 = vrot.slane %v73_v4, 1  ;;  %681 = vmatpush1.bf16.msra.mxu1 %v932_v33  ;;  %v942_v48 = vld [vmem:[%s1753_s4 + $0x84] ss:$8 sps:$4 sm:$0xff]   ;;  %v950_v55 = vld [vmem:[%s1753_s4 + $0xa0] ss:$8 sps:$4 sm:$0xff]  }
  0x3e   :  { %914 = vmatprep.subr.bf16.mxu0 %v913_v34  ;;  %v933_v34 = vld [vmem:[%s1753_s4 + $0x54] ss:$8 sps:$4 sm:$0xff]   ;;  %v954_v60 = vld [vmem:[%s1753_s4 + $0xc4] ss:$8 sps:$4 sm:$0xff]  }
  0x3f   :  { %v144_v5 = vrot.slane %v143_v63, 4  ;;  %v170_v10 = vadd.f32 %v169_v3, %v168_v59  ;;  %v75_v21 = vadd.f32 %v74_v18, %v73_v4  ;;  %682 = vmatprep.subr.bf16.mxu1 %v933_v34  ;;  %v951_v58 = vld [vmem:[%s1753_s4 + $0xb4] ss:$8 sps:$4 sm:$0xff]   ;;  %v953_v59 = vld [vmem:[%s1753_s4 + $0xb0] ss:$8 sps:$4 sm:$0xff]  }
  0x40   :  { %v959_v3 = vld [vmem:[%s1753_s4 + $0xd0] ss:$8 sps:$4 sm:$0xff]   ;;  %v960_v4 = vld [vmem:[%s1753_s4 + $0xe4] ss:$8 sps:$4 sm:$0xff]   ;;  %v970_v34 = vmov 1966171168  }
  0x41   :  { %916 = vmatpush1.bf16.msra.mxu0 %v915_v53  ;;  %v145_v12 = vadd.f32 %v144_v5, %v143_v63  ;;  %v173_v15 = vsel %vm171_vm0, %v96_v0, %v170_v10  ;;  %683 = vmatpush1.bf16.msra.mxu1 %v935_v35  ;;  %v947_v53 = vld [vmem:[%s1753_s4 + $0x90] ss:$8 sps:$4 sm:$0xff]   ;;  %v956_v63 = vld [vmem:[%s1753_s4 + $0xc0] ss:$8 sps:$4 sm:$0xff]   ;;  %v957_v0 = vld [vmem:[%s1753_s4 + $0xd4] ss:$8 sps:$4 sm:$0xff]   ;;  %v328_v35 = vunpack.c.l.s4 %v970_v34 }
  0x42   :  { %302 = vmatprep.mubr.f32.mxu0 %v173_v15  ;;  %684 = vmatprep.subr.bf16.mxu1 %v936_v36  ;;  %v962_v5 = vld [vmem:[%s1753_s4 + $0xe0] ss:$8 sps:$4 sm:$0xff]   ;;  %v963_v10 = vld [vmem:[%s1753_s4 + $0xf4] ss:$8 sps:$4 sm:$0xff]   ;;  %v330_v36 = vlaneseq }
  0x43   :  { %v146_v19 = vrot.slane %v145_v12, 2 }
  0x45   :  { %v147_v20 = vadd.f32 %v146_v19, %v145_v12  ;;  %685 = vmatpush1.bf16.msra.mxu1 %v938_v37  ;;  %v965_v12 = vld [vmem:[%s1753_s4 + $0xf0] ss:$8 sps:$4 sm:$0xff]   ;;  %v329_v37 = vunpack.c.0.s8 %v328_v35 }
  0x46   :  { %686 = vmatprep.subr.bf16.mxu1 %v939_v40  ;;  %v331_v40 = vshrl.u32 %v330_v36, 7 }
  0x47   :  { %v148_v23 = vrot.slane %v147_v20, 1 }
  0x49   :  { %v149_v28 = vadd.f32 %v148_v23, %v147_v20  ;;  %687 = vmatpush1.bf16.msra.mxu1 %v941_v44 }
  0x4a   :  { %688 = vmatprep.subr.bf16.mxu1 %v942_v48  ;;  %v332_v48 = vsub.s32 %v329_v37, %v331_v40 }
  0x4b   :  { %v172_v29 = vsel %vm171_vm0, %v75_v21, %v149_v28 }
  0x4c   :  { %303 = vmatmul.mubr.f32.vlgmr.msra.gmra.mrb[0].mxu0 %v172_v29 }
  0x4d   :  { %689 = vmatpush1.bf16.msra.mxu1 %v944_v50 }
  0x4e   :  { %690 = vmatprep.subr.bf16.mxu1 %v945_v51 }
  0x51   :  { %691 = vmatpush1.bf16.msra.mxu1 %v947_v53 }
  0x52   :  { %692 = vmatprep.subr.bf16.mxu1 %v948_v54 }
  0x55   :  { %693 = vmatpush1.bf16.msra.mxu1 %v950_v55  ;;  %v319_v55 = vld [vmem:[%s1754_s1] sm:$0x3] }
  0x56   :  { %694 = vmatprep.subr.bf16.mxu1 %v951_v58 }
  0x59   :  { %695 = vmatpush1.bf16.msra.mxu1 %v953_v59  ;;  %v1571_v59 = vsub.s32 0, %v331_v40 }
  0x5a   :  { %696 = vmatprep.subr.bf16.mxu1 %v954_v60  ;;  %v1573_v60 = vsub.s32 1, %v331_v40 }
  0x5d   :  { %697 = vmatpush1.bf16.msra.mxu1 %v956_v63 }
  0x5e   :  { %698 = vmatprep.subr.bf16.mxu1 %v957_v0 }
  0x61   :  { %699 = vmatpush1.bf16.msra.mxu1 %v959_v3 }
  0x62   :  { %700 = vmatprep.subr.bf16.mxu1 %v960_v4 }
  0x65   :  { %701 = vmatpush1.bf16.msra.mxu1 %v962_v5 }
  0x66   :  { %702 = vmatprep.subr.bf16.mxu1 %v963_v10 }
  0x69   :  { %703 = vmatpush1.bf16.msra.mxu1 %v965_v12 }
 0x11f   :  { %v304_v15 = vpop.f32.mrb[0].mxu0 }
 0x120   :  { %v309_v18 = vmul.f32 %v304_v15, %v304_v15  ;;  %v306_v19 = vpop.f32.mrb[1].mxu0 }
 0x121   :  { %v310_v20 = vmul.f32 %v306_v19, %v306_v19 }
 0x122   :  { %v313_v21 = vrot.slane %v309_v18, 7 }
 0x123   :  { %v314_v23 = vrot.slane %v310_v20, 7 }
 0x124   :  { %v317_v28 = vsub.f32 %v304_v15, %v313_v21 }
 0x125   :  { %v318_v29 = vsub.f32 %v306_v19, %v314_v23 }
 0x126   :  { %v320_v31 = vadd.f32 1e-05, %v317_v28 }
 0x127   :  { %v321_v33 = vadd.f32 1e-05, %v318_v29 }
 0x128   :  { %966 = vrsqrt.f32 %v320_v31 }
 0x129   :  { %968 = vrsqrt.f32 %v321_v33 }
 0x132   :  { %v967_v44 = vpop.eup %966 }
 0x133   :  { %v969_v50 = vpop.eup %968 }
 0x134   :  { %v326_v51 = vcombine.low %v967_v44, %v969_v50 }
 0x136   :  { %v333_v53 = vrot.slane %v326_v51, %v332_v48 }
 0x138   :  { %v334_v54 = vcombine.high %v333_v53, %v333_v53 }
 0x13a   :  { %v341_v58 = vrot.slane %v334_v54, %v332_v48 }
 0x13c   :  { %v343_v63 = vmul.f32 %v341_v58, %v319_v55 }
 0x13e   :  { %v349_v0 = vrot.slane %v343_v63, %v1571_v59  ;;  %v353_v3 = vrot.slane %v343_v63, %v1573_v60 }
 0x140   :  { %v356_v4 = vmul.f32 %v349_v0, %v304_v15  ;;  %v357_v5 = vmul.f32 %v353_v3, %v306_v19  ;;  %v378_v12 = vmul.f32 %v353_v3, %v1096_v42  ;;  %v380_v18 = vmul.f32 %v353_v3, %v1101_v43  ;;  %v344_v15 = vld [vmem:[%s1755_s2] sm:$0x3] }
 0x141   :  { %v377_v20 = vmul.f32 %v349_v0, %v1155_v1  ;;  %v379_v21 = vmul.f32 %v349_v0, %v1160_v2  ;;  %v382_v23 = vmul.f32 %v353_v3, %v1109_v45  ;;  %v384_v29 = vmul.f32 %v353_v3, %v1114_v46 }
 0x142   :  { %v360_v10 = vcombine.low %v356_v4, %v357_v5  ;;  %v381_v31 = vmul.f32 %v349_v0, %v1187_v14  ;;  %v383_v33 = vmul.f32 %v349_v0, %v1220_v25  ;;  %v386_v42 = vmul.f32 %v353_v3, %v1127_v52 }
 0x143   :  { %v388_v43 = vmul.f32 %v353_v3, %v1147_v61  ;;  %v385_v1 = vmul.f32 %v349_v0, %v1225_v26  ;;  %v387_v2 = vmul.f32 %v349_v0, %v1273_v47  ;;  %v390_v19 = vmul.f32 %v353_v3, %v1171_v6 }
 0x144   :  { %v367_v28 = vrot.slane %v360_v10, %v332_v48  ;;  %v392_v46 = vmul.f32 %v353_v3, %v1202_v17  ;;  %v389_v14 = vmul.f32 %v349_v0, %v1288_v56  ;;  %v391_v25 = vmul.f32 %v349_v0, %v1318_v9 }
 0x145   :  { %v394_v34 = vmul.f32 %v353_v3, %v1213_v22  ;;  %v396_v35 = vmul.f32 %v353_v3, %v1240_v30  ;;  %v393_v52 = vmul.f32 %v349_v0, %v1338_v16  ;;  %v395_v26 = vmul.f32 %v349_v0, %v1370_v39 }
 0x146   :  { %v374_v45 = vrot.slane %v367_v28, %v332_v48  ;;  %v398_v47 = vmul.f32 %v353_v3, %v1267_v41  ;;  %v400_v36 = vmul.f32 %v353_v3, %v1304_v62  ;;  %v397_v6 = vmul.f32 %v349_v0, %v1401_v7 }
 0x147   :  { %v399_v17 = vmul.f32 %v349_v0, %v1423_v24  ;;  %v402_v56 = vmul.f32 %v353_v3, %v1332_v13  ;;  %v404_v9 = vmul.f32 %v353_v3, %v1361_v32  ;;  %v401_v16 = vmul.f32 %v349_v0, %v1440_v38 }
 0x148   :  { %v376_v61 = vsub.f32 %v344_v15, %v374_v45  ;;  %v403_v39 = vmul.f32 %v349_v0, %v1455_v57  ;;  %v406_v41 = vmul.f32 %v353_v3, %v1384_v49  ;;  %v408_v62 = vmul.f32 %v353_v3, %v1412_v11 }
 0x149   :  { %v405_v7 = vmul.f32 %v349_v0, %v1469_v8  ;;  %v407_v24 = vmul.f32 %v349_v0, %v1483_v27 }
 0x14a   :  { %v413_v22 = vrot.slane %v376_v61, %v1571_v59  ;;  %v417_v30 = vrot.slane %v376_v61, %v1573_v60 }
 0x14c   :  { %v421_v37 = vadd.f32 %v417_v30, %v378_v12  ;;  %v423_v13 = vadd.f32 %v417_v30, %v380_v18  ;;  %v420_v40 = vadd.f32 %v413_v22, %v377_v20  ;;  %v422_v32 = vadd.f32 %v413_v22, %v379_v21 }
 0x14d   :  { %v425_v44 = vadd.f32 %v417_v30, %v382_v23  ;;  %v427_v48 = vadd.f32 %v417_v30, %v384_v29  ;;  %v424_v50 = vadd.f32 %v413_v22, %v381_v31  ;;  %v426_v51 = vadd.f32 %v413_v22, %v383_v33 }
 0x14e   :  { %v453_v53 = vpack.c.bf16 %v423_v13, %v421_v37  ;;  %v452_v38 = vpack.c.bf16 %v422_v32, %v420_v40  ;;  %v429_v54 = vadd.f32 %v417_v30, %v386_v42  ;;  %v431_v57 = vadd.f32 %v417_v30, %v388_v43 }
 0x14f   :  { %v455_v55 = vpack.c.bf16 %v427_v48, %v425_v44  ;;  %v454_v49 = vpack.c.bf16 %v426_v51, %v424_v50  ;;  %v428_v58 = vadd.f32 %v413_v22, %v385_v1  ;;  %v430_v11 = vadd.f32 %v413_v22, %v387_v2 }
 0x150   :  { %704 = vmatprep.mubr.bf16.mxu1 %v453_v53  ;;  %v457_v8 = vpack.c.bf16 %v431_v57, %v429_v54  ;;  %v433_v63 = vadd.f32 %v417_v30, %v390_v19  ;;  %v435_v27 = vadd.f32 %v417_v30, %v392_v46  ;;  %v432_v0 = vadd.f32 %v413_v22, %v389_v14 }
 0x151   :  { %705 = vmatmul.mubr.bf16.vlgmr.msra.gmra.mrb[0].mxu1 %v452_v38  ;;  %v456_v3 = vpack.c.bf16 %v430_v11, %v428_v58  ;;  %v434_v4 = vadd.f32 %v413_v22, %v391_v25  ;;  %v437_v5 = vadd.f32 %v417_v30, %v394_v34  ;;  %v439_v10 = vadd.f32 %v417_v30, %v396_v35 }
 0x152   :  { %714 = vmatprep.mubr.bf16.mxu1 %v455_v55  ;;  %v459_v12 = vpack.c.bf16 %v435_v27, %v433_v63  ;;  %v436_v18 = vadd.f32 %v413_v22, %v393_v52  ;;  %v438_v20 = vadd.f32 %v413_v22, %v395_v26  ;;  %v441_v21 = vadd.f32 %v417_v30, %v398_v47  ;;  %v500_v47 = vld [vmem:[%s1756_s5] sm:$0x3] }
 0x153   :  { %v458_v23 = vpack.c.bf16 %v434_v4, %v432_v0  ;;  %v461_v28 = vpack.c.bf16 %v439_v10, %v437_v5  ;;  %v443_v29 = vadd.f32 %v417_v30, %v400_v36  ;;  %v440_v31 = vadd.f32 %v413_v22, %v397_v6 }
 0x154   :  { %v460_v33 = vpack.c.bf16 %v438_v20, %v436_v18  ;;  %v442_v15 = vadd.f32 %v413_v22, %v399_v17  ;;  %v445_v42 = vadd.f32 %v417_v30, %v402_v56  ;;  %v447_v43 = vadd.f32 %v417_v30, %v404_v9 }
 0x155   :  { %v463_v1 = vpack.c.bf16 %v443_v29, %v441_v21  ;;  %v444_v2 = vadd.f32 %v413_v22, %v401_v16  ;;  %v446_v45 = vadd.f32 %v413_v22, %v403_v39  ;;  %v449_v19 = vadd.f32 %v417_v30, %v406_v41 }
 0x156   :  { %v462_v46 = vpack.c.bf16 %v442_v15, %v440_v31  ;;  %v465_v14 = vpack.c.bf16 %v447_v43, %v445_v42  ;;  %v451_v25 = vadd.f32 %v417_v30, %v408_v62  ;;  %v448_v34 = vadd.f32 %v413_v22, %v405_v7 }
 0x157   :  { %v464_v35 = vpack.c.bf16 %v446_v45, %v444_v2  ;;  %v450_v52 = vadd.f32 %v413_v22, %v407_v24  ;;  %v1618_v36 = vrot.slane %v500_v47, %v1571_v59  ;;  %v1621_v6 = vrot.slane %v500_v47, %v1573_v60 }
 0x158   :  { %v467_v61 = vpack.c.bf16 %v451_v25, %v449_v19 }
 0x159   :  { %715 = vmatmul.mubr.bf16.gmra.mrb[4].mxu1 %v454_v49  ;;  %v466_v26 = vpack.c.bf16 %v450_v52, %v448_v34 }
 0x15a   :  { %724 = vmatprep.mubr.bf16.mxu1 %v457_v8 }
 0x161   :  { %725 = vmatmul.mubr.bf16.gmra.mrb[8].mxu1 %v456_v3 }
 0x162   :  { %734 = vmatprep.mubr.bf16.mxu1 %v459_v12 }
 0x169   :  { %735 = vmatmul.mubr.bf16.gmra.mrb[12].mxu1 %v458_v23 }
 0x16a   :  { %744 = vmatprep.mubr.bf16.mxu1 %v461_v28 }
 0x171   :  { %745 = vmatmul.mubr.bf16.gmra.mrb[16].mxu1 %v460_v33 }
 0x172   :  { %754 = vmatprep.mubr.bf16.mxu1 %v463_v1 }
 0x179   :  { %755 = vmatmul.mubr.bf16.gmra.mrb[20].mxu1 %v462_v46 }
 0x17a   :  { %764 = vmatprep.mubr.bf16.mxu1 %v465_v14 }
 0x181   :  { %765 = vmatmul.mubr.bf16.gmra.mrb[24].mxu1 %v464_v35 }
 0x182   :  { %774 = vmatprep.mubr.bf16.mxu1 %v467_v61 }
 0x189   :  { %775 = vmatmul.mubr.bf16.gmra.mrb[28].mxu1 %v466_v26 }
 0x224   :  { %v706_v17 = vpop.f32.mrb[0].mxu1 }
 0x225   :  { %v707_v56 = vadd.f32 %v706_v17, %v1618_v36  ;;  %v708_v9 = vpop.f32.mrb[1].mxu1 }
 0x226   :  { %v709_v22 = vadd.f32 %v708_v9, %v1621_v6  ;;  %v710_v30 = vpop.f32.mrb[2].mxu1 }
 0x227   :  { %785 = vst [vmem:[%s1757_s6] sm:$0xff] %v707_v56  ;;  %v711_v16 = vadd.f32 %v710_v30, %v1618_v36  ;;  %v712_v39 = vpop.f32.mrb[3].mxu1 }
 0x228   :  { %786 = vst [vmem:[%s1757_s6 + $0x8] sm:$0xff] %v709_v22  ;;  %v713_v59 = vadd.f32 %v712_v39, %v1621_v6 }
 0x229   :  { %787 = vst [vmem:[%s1757_s6 + $0x10] sm:$0xff] %v711_v16 }
 0x22a   :  { %788 = vst [vmem:[%s1757_s6 + $0x18] sm:$0xff] %v713_v59 }
 0x22c   :  { %v716_v60 = vpop.f32.mrb[4].mxu1 }
 0x22d   :  { %v717_v41 = vadd.f32 %v716_v60, %v1618_v36  ;;  %v718_v62 = vpop.f32.mrb[5].mxu1 }
 0x22e   :  { %v719_v7 = vadd.f32 %v718_v62, %v1621_v6  ;;  %v720_v24 = vpop.f32.mrb[6].mxu1 }
 0x22f   :  { %789 = vst [vmem:[%s1757_s6 + $0x20] sm:$0xff] %v717_v41  ;;  %v721_v37 = vadd.f32 %v720_v24, %v1618_v36  ;;  %v722_v13 = vpop.f32.mrb[7].mxu1 }
 0x230   :  { %790 = vst [vmem:[%s1757_s6 + $0x28] sm:$0xff] %v719_v7  ;;  %v723_v40 = vadd.f32 %v722_v13, %v1621_v6 }
 0x231   :  { %791 = vst [vmem:[%s1757_s6 + $0x30] sm:$0xff] %v721_v37 }
 0x232   :  { %792 = vst [vmem:[%s1757_s6 + $0x38] sm:$0xff] %v723_v40 }
 0x234   :  { %v726_v32 = vpop.f32.mrb[8].mxu1 }
 0x235   :  { %v727_v44 = vadd.f32 %v726_v32, %v1618_v36  ;;  %v728_v48 = vpop.f32.mrb[9].mxu1 }
 0x236   :  { %v729_v50 = vadd.f32 %v728_v48, %v1621_v6  ;;  %v730_v51 = vpop.f32.mrb[10].mxu1 }
 0x237   :  { %793 = vst [vmem:[%s1757_s6 + $0x40] sm:$0xff] %v727_v44  ;;  %v731_v53 = vadd.f32 %v730_v51, %v1618_v36  ;;  %v732_v38 = vpop.f32.mrb[11].mxu1 }
 0x238   :  { %794 = vst [vmem:[%s1757_s6 + $0x48] sm:$0xff] %v729_v50  ;;  %v733_v54 = vadd.f32 %v732_v38, %v1621_v6 }
 0x239   :  { %795 = vst [vmem:[%s1757_s6 + $0x50] sm:$0xff] %v731_v53 }
 0x23a   :  { %796 = vst [vmem:[%s1757_s6 + $0x58] sm:$0xff] %v733_v54 }
 0x23c   :  { %v736_v57 = vpop.f32.mrb[12].mxu1 }
 0x23d   :  { %v737_v55 = vadd.f32 %v736_v57, %v1618_v36  ;;  %v738_v49 = vpop.f32.mrb[13].mxu1 }
 0x23e   :  { %v739_v58 = vadd.f32 %v738_v49, %v1621_v6  ;;  %v740_v11 = vpop.f32.mrb[14].mxu1 }
 0x23f   :  { %797 = vst [vmem:[%s1757_s6 + $0x60] sm:$0xff] %v737_v55  ;;  %v741_v8 = vadd.f32 %v740_v11, %v1618_v36  ;;  %v742_v63 = vpop.f32.mrb[15].mxu1 }
 0x240   :  { %798 = vst [vmem:[%s1757_s6 + $0x68] sm:$0xff] %v739_v58  ;;  %v743_v27 = vadd.f32 %v742_v63, %v1621_v6 }
 0x241   :  { %799 = vst [vmem:[%s1757_s6 + $0x70] sm:$0xff] %v741_v8 }
 0x242   :  { %800 = vst [vmem:[%s1757_s6 + $0x78] sm:$0xff] %v743_v27 }
 0x244   :  { %v746_v0 = vpop.f32.mrb[16].mxu1 }
 0x245   :  { %v747_v3 = vadd.f32 %v746_v0, %v1618_v36  ;;  %v748_v4 = vpop.f32.mrb[17].mxu1 }
 0x246   :  { %v749_v5 = vadd.f32 %v748_v4, %v1621_v6  ;;  %v750_v10 = vpop.f32.mrb[18].mxu1 }
 0x247   :  { %801 = vst [vmem:[%s1757_s6 + $0x80] sm:$0xff] %v747_v3  ;;  %v751_v12 = vadd.f32 %v750_v10, %v1618_v36  ;;  %v752_v18 = vpop.f32.mrb[19].mxu1 }
 0x248   :  { %802 = vst [vmem:[%s1757_s6 + $0x88] sm:$0xff] %v749_v5  ;;  %v753_v20 = vadd.f32 %v752_v18, %v1621_v6 }
 0x249   :  { %803 = vst [vmem:[%s1757_s6 + $0x90] sm:$0xff] %v751_v12 }
 0x24a   :  { %804 = vst [vmem:[%s1757_s6 + $0x98] sm:$0xff] %v753_v20 }
 0x24c   :  { %v756_v21 = vpop.f32.mrb[20].mxu1 }
 0x24d   :  { %v757_v23 = vadd.f32 %v756_v21, %v1618_v36  ;;  %v758_v28 = vpop.f32.mrb[21].mxu1 }
 0x24e   :  { %v759_v29 = vadd.f32 %v758_v28, %v1621_v6  ;;  %v760_v31 = vpop.f32.mrb[22].mxu1 }
 0x24f   :  { %805 = vst [vmem:[%s1757_s6 + $0xa0] sm:$0xff] %v757_v23  ;;  %v761_v33 = vadd.f32 %v760_v31, %v1618_v36  ;;  %v762_v15 = vpop.f32.mrb[23].mxu1 }
 0x250   :  { %806 = vst [vmem:[%s1757_s6 + $0xa8] sm:$0xff] %v759_v29  ;;  %v763_v42 = vadd.f32 %v762_v15, %v1621_v6 }
 0x251   :  { %807 = vst [vmem:[%s1757_s6 + $0xb0] sm:$0xff] %v761_v33 }
 0x252   :  { %808 = vst [vmem:[%s1757_s6 + $0xb8] sm:$0xff] %v763_v42 }
 0x254   :  { %v766_v43 = vpop.f32.mrb[24].mxu1 }
 0x255   :  { %v767_v1 = vadd.f32 %v766_v43, %v1618_v36  ;;  %v768_v2 = vpop.f32.mrb[25].mxu1 }
 0x256   :  { %v769_v45 = vadd.f32 %v768_v2, %v1621_v6  ;;  %v770_v19 = vpop.f32.mrb[26].mxu1 }
 0x257   :  { %809 = vst [vmem:[%s1757_s6 + $0xc0] sm:$0xff] %v767_v1  ;;  %v771_v46 = vadd.f32 %v770_v19, %v1618_v36  ;;  %v772_v14 = vpop.f32.mrb[27].mxu1 }
 0x258   :  { %810 = vst [vmem:[%s1757_s6 + $0xc8] sm:$0xff] %v769_v45  ;;  %v773_v25 = vadd.f32 %v772_v14, %v1621_v6 }
 0x259   :  { %811 = vst [vmem:[%s1757_s6 + $0xd0] sm:$0xff] %v771_v46 }
 0x25a   :  { %812 = vst [vmem:[%s1757_s6 + $0xd8] sm:$0xff] %v773_v25 }
 0x25c   :  { %v776_v34 = vpop.f32.mrb[28].mxu1 }
 0x25d   :  { %v777_v35 = vadd.f32 %v776_v34, %v1618_v36  ;;  %v778_v52 = vpop.f32.mrb[29].mxu1 }
 0x25e   :  { %v779_v61 = vadd.f32 %v778_v52, %v1621_v6  ;;  %v780_v26 = vpop.f32.mrb[30].mxu1 }
 0x25f   :  { %813 = vst [vmem:[%s1757_s6 + $0xe0] sm:$0xff] %v777_v35  ;;  %v781_v47 = vadd.f32 %v780_v26, %v1618_v36  ;;  %v782_v17 = vpop.f32.mrb[31].mxu1 }
 0x260   :  { %814 = vst [vmem:[%s1757_s6 + $0xe8] sm:$0xff] %v779_v61  ;;  %v783_v56 = vadd.f32 %v782_v17, %v1621_v6 }
 0x261   :  { %815 = vst [vmem:[%s1757_s6 + $0xf0] sm:$0xff] %v781_v47 }
 0x262   :  { %816 = vst [vmem:[%s1757_s6 + $0xf8] sm:$0xff] %v783_v56 }

</bundles_post_ra>
